<compile_context>
chip_gen: v5e
topology: v5e:2x2
jax: 0.10.0
libtpu: 0.0.40
codegen_flags: <defaults>
</compile_context>

<pallas_src>
import math

import jax
import jax.numpy as jnp
import numpy as np
from jax.experimental import pallas as pl
from jax.experimental.pallas import tpu as pltpu

LETTERS_LEN = 34
SPEECH_PARTS_LEN = 23
PARTS_MAPPING_LEN = 11
INPUT_CHANNELS = LETTERS_LEN + 1 + 1 + SPEECH_PARTS_LEN  # 59

LN_EPS = 1e-5  # torch.nn.LayerNorm default
LANE = 128

# Lane offsets of the segments inside the per-layer weight slab (all 128-aligned).
QKV_OFF = 0
WO_OFF = 128
W1_OFF = 256
WL_WIDTH = 384


def _layer_norm_1pass(v, w, b):
    # Single-pass LayerNorm: var = E[x^2] - mean^2 (one sweep over the lane dim).
    mu = jnp.mean(v, axis=-1, keepdims=True)
    mu2 = jnp.mean(v * v, axis=-1, keepdims=True)
    var = jnp.maximum(mu2 - mu * mu, 0.0)
    return (v - mu) * jax.lax.rsqrt(var + LN_EPS) * w + b


def _layer_norm_ref(v, w, b):
    mu = jnp.mean(v, axis=-1, keepdims=True)
    var = jnp.mean((v - mu) ** 2, axis=-1, keepdims=True)
    return (v - mu) * jax.lax.rsqrt(var + LN_EPS) * w + b


def _gelu_tanh(x):
    # tanh-form GELU: |diff vs exact erf GELU| < ~3e-3, runs on the EUP.
    c = math.sqrt(2.0 / math.pi)
    return 0.5 * x * (1.0 + jnp.tanh(c * (x + 0.044715 * x * x * x)))


def positional_encoding(d_model, max_len=20):
    pos = np.arange(max_len, dtype=np.float32)[:, None]
    div = np.exp(np.arange(0, d_model, 2, dtype=np.float32) *
                 (-math.log(10000.0) / d_model))
    enc = np.zeros((max_len, d_model), dtype=np.float32)
    enc[:, 0::2] = np.sin(pos * div)
    enc[:, 1::2] = np.cos(pos * div)
    return jnp.asarray(enc)


def init_params(key, d_model, num_layers, dim_ff,
                parts_len=PARTS_MAPPING_LEN, in_ch=INPUT_CHANNELS):
    keys = jax.random.split(key, 16)

    def w(k, shape):
        scale = 1.0 / math.sqrt(shape[-2])
        return (scale * jax.random.normal(k, shape)).astype(jnp.float32)

    def b(k, shape):
        return (0.01 * jax.random.normal(k, shape)).astype(jnp.float32)

    L, D, F = num_layers, d_model, dim_ff
    p = {}
    p["emb_w"] = w(keys[0], (in_ch, D))
    p["emb_b"] = b(keys[1], (1, D))
    p["wq"] = w(keys[2], (L, D, D))
    p["bq"] = b(keys[3], (L, 1, D))
    p["wk"] = w(keys[4], (L, D, D))
    p["bk"] = b(keys[5], (L, 1, D))
    p["wv"] = w(keys[6], (L, D, D))
    p["bv"] = b(keys[7], (L, 1, D))
    p["wo"] = w(keys[8], (L, D, D))
    p["bo"] = b(keys[9], (L, 1, D))
    p["ln1_w"] = jnp.ones((L, 1, D), jnp.float32)
    p["ln1_b"] = jnp.zeros((L, 1, D), jnp.float32)
    p["w1"] = w(keys[10], (L, D, F))
    p["b1"] = b(keys[11], (L, 1, F))
    p["w2"] = w(keys[12], (L, F, D))
    p["b2"] = b(keys[13], (L, 1, D))
    p["ln2_w"] = jnp.ones((L, 1, D), jnp.float32)
    p["ln2_b"] = jnp.zeros((L, 1, D), jnp.float32)
    p["wd"] = w(keys[14], (D, parts_len))
    p["bd"] = b(keys[15], (1, parts_len))
    return p


def _pack_params(params, pe, nhead):
    """Pack the 20 parameter arrays (+ positional encoding) into a few slabs."""
    D = params["emb_w"].shape[1]
    F = params["w1"].shape[2]
    L = params["wq"].shape[0]
    P = params["wd"].shape[1]
    C = params["emb_w"].shape[0]
    C_pad = 64
    hd = D // nhead
    scale = 1.0 / math.sqrt(hd)

    assert C <= C_pad and 3 * D <= WO_OFF and WO_OFF + D <= W1_OFF
    assert F <= WL_WIDTH - W1_OFF and P <= LANE

    # Embedding weight, K-dim (rows) zero-padded to 64 for aligned loads.
    emb_w_pad = jnp.zeros((C_pad, D), jnp.float32).at[:C, :].set(params["emb_w"])

    # Positional encoding + embedding bias, passed once (broadcast in-kernel).
    bias_pe = pe + params["emb_b"]                                 # (S, D)

    # Softmax scale folded into Wq / bq.
    wq_s = params["wq"] * scale
    bq_s = params["bq"] * scale

    # Per-layer matrix slab, every segment starting at a 128-lane boundary:
    #   lanes [0 : 3D)         -> [Wq | Wk | Wv]   (Wq pre-scaled)
    #   lanes [128 : 128 + D)  -> Wo
    #   lanes [256 : 256 + F)  -> W1
    w_layer = jnp.zeros((L, D, WL_WIDTH), jnp.float32)
    w_layer = w_layer.at[:, :, 0:D].set(wq_s)
    w_layer = w_layer.at[:, :, D:2 * D].set(params["wk"])
    w_layer = w_layer.at[:, :, 2 * D:3 * D].set(params["wv"])
    w_layer = w_layer.at[:, :, WO_OFF:WO_OFF + D].set(params["wo"])
    w_layer = w_layer.at[:, :, W1_OFF:W1_OFF + F].set(params["w1"])

    w_ff2 = params["w2"]                                           # (L, F, D)

    # Per-layer vector slab (biases + LayerNorm params): (L, 8, 128).
    vec = jnp.zeros((L, 8, LANE), jnp.float32)
    bqkv = jnp.concatenate([bq_s, params["bk"], params["bv"]], axis=-1)
    vec = vec.at[:, 0:1, :3 * D].set(bqkv)
    vec = vec.at[:, 1:2, :D].set(params["bo"])
    vec = vec.at[:, 2:3, :D].set(params["ln1_w"])
    vec = vec.at[:, 3:4, :D].set(params["ln1_b"])
    vec = vec.at[:, 4:5, :F].set(params["b1"])
    vec = vec.at[:, 5:6, :D].set(params["b2"])
    vec = vec.at[:, 6:7, :D].set(params["ln2_w"])
    vec = vec.at[:, 7:8, :D].set(params["ln2_b"])

    # Classifier head slab: rows 0:D = Wd (lanes zero-padded to 128),
    # row D = bd, remaining rows zero (sublane-aligned row count).
    head_rows = ((D + 1 + 7) // 8) * 8
    head = jnp.zeros((head_rows, LANE), jnp.float32)
    head = head.at[:D, :P].set(params["wd"])
    head = head.at[D:D + 1, :P].set(params["bd"])

    return emb_w_pad, bias_pe, w_layer, w_ff2, vec, head


def transformer_morph_forward(x, params, pe, *, nhead):
    B, S, C = x.shape
    D = params["emb_w"].shape[1]
    F = params["w1"].shape[2]
    L = params["wq"].shape[0]
    P = params["wd"].shape[1]
    assert D % nhead == 0
    hd = D // nhead
    M = B * S
    C_pad = 64

    emb_w_pad, bias_pe, w_layer, w_ff2, vec, head = _pack_params(params, pe, nhead)

    # Row-stack the batch and zero-pad channels (padded weight rows are zero,
    # so padded input lanes contribute nothing).
    x_flat = jnp.zeros((M, C_pad), jnp.float32).at[:, :C].set(
        x.reshape(M, C).astype(jnp.float32))

    def kernel(x_ref, bpe_ref, emb_ref, wl_ref, wff2_ref, vec_ref, head_ref,
               o_ref):
        # embedding, then (positional encoding + embedding bias) broadcast
        # over batch (bpe is (S, D), not tiled host-side).
        h = jnp.dot(x_ref[...], emb_ref[...],
                    preferred_element_type=jnp.float32)              # (M, D)
        h = (h.reshape(B, S, D) + bpe_ref[...]).reshape(M, D)

        # Python-unrolled layers; fine for small L.  For large L this would
        # become a grid axis / fori_loop streaming per-layer weights.
        for l in range(L):
            wl = wl_ref[l]                    # (D, WL_WIDTH), segments 128-aligned
            vl = vec_ref[l]                   # (8, 128)

            # --- fused QKV projection (softmax scale pre-folded into Wq/bq) ---
            qkv = jnp.dot(h, wl[:, :3 * D],
                          preferred_element_type=jnp.float32) + vl[0:1, :3 * D]
            qkv3 = qkv.reshape(B, S, 3 * D)

            # --- per-sample, per-head attention (no mask, no K transpose) ---
            heads = []
            for hh in range(nhead):
                lo = hh * hd
                qh = qkv3[:, :, lo:lo + hd]                    # (B, S, hd)
                kh = qkv3[:, :, D + lo:D + lo + hd]
                vh = qkv3[:, :, 2 * D + lo:2 * D + lo + hd]
                s = jnp.einsum("bqd,bkd->bqk", qh, kh,
                               preferred_element_type=jnp.float32)
                s = s - jnp.max(s, axis=-1, keepdims=True)
                e = jnp.exp(s)
                a = e * pl.reciprocal(jnp.sum(e, axis=-1, keepdims=True),
                                      approx=True)
                heads.append(jnp.einsum("bqk,bkd->bqd", a, vh,
                                        preferred_element_type=jnp.float32))

            # --- concat heads in-register, single output projection ---
            attn = jnp.concatenate(heads, axis=-1).reshape(M, D)
            attn = jnp.dot(attn, wl[:, WO_OFF:WO_OFF + D],
                           preferred_element_type=jnp.float32) + vl[1:2, :D]
            # dropout is identity in eval mode
            h = _layer_norm_1pass(h + attn, vl[2:3, :D], vl[3:4, :D])

            # --- feed-forward ---
            ff = jnp.dot(h, wl[:, W1_OFF:W1_OFF + F],
                         preferred_element_type=jnp.float32) + vl[4:5, :F]
            ff = _gelu_tanh(ff)
            ff = jnp.dot(ff, wff2_ref[l],
                         preferred_element_type=jnp.float32) + vl[5:6, :D]
            h = _layer_norm_1pass(h + ff, vl[6:7, :D], vl[7:8, :D])

        # final dropout (identity) + dense head, lane-dense 128-wide store
        out = jnp.dot(h, head_ref[:D, :],
                      preferred_element_type=jnp.float32) + head_ref[D:D + 1, :]
        o_ref[...] = out

    vmem = pl.BlockSpec(memory_space=pltpu.MemorySpace.VMEM)
    out_pad = pl.pallas_call(
        kernel,
        out_shape=jax.ShapeDtypeStruct((M, LANE), jnp.float32),
        in_specs=[vmem] * 7,
        out_specs=vmem,
    )(x_flat, bias_pe, emb_w_pad, w_layer, w_ff2, vec, head)

    # Padded lanes are exactly zero; slice back to the real class count.
    return out_pad.reshape(B, S, LANE)[:, :, :P]


def reference_forward(x, params, pe, *, nhead):
    # Pure-JAX reference of the PyTorch forward (eval mode, post-norm layers,
    # exact erf GELU, HIGHEST matmul precision).
    B, S, _ = x.shape
    D = params["emb_w"].shape[1]
    L = params["wq"].shape[0]
    hd = D // nhead
    hp = jax.lax.Precision.HIGHEST
    h = jnp.einsum("bsc,cd->bsd", x, params["emb_w"], precision=hp) + params["emb_b"][None]
    h = h + pe[None]
    for l in range(L):
        q = jnp.einsum("bsd,de->bse", h, params["wq"][l], precision=hp) + params["bq"][l][None]
        k = jnp.einsum("bsd,de->bse", h, params["wk"][l], precision=hp) + params["bk"][l][None]
        v = jnp.einsum("bsd,de->bse", h, params["wv"][l], precision=hp) + params["bv"][l][None]
        qh = q.reshape(B, S, nhead, hd).transpose(0, 2, 1, 3)
        kh = k.reshape(B, S, nhead, hd).transpose(0, 2, 1, 3)
        vh = v.reshape(B, S, nhead, hd).transpose(0, 2, 1, 3)
        s = jnp.einsum("bhqd,bhkd->bhqk", qh, kh, precision=hp) / math.sqrt(hd)
        a = jax.nn.softmax(s, axis=-1)
        o = jnp.einsum("bhqk,bhkd->bhqd", a, vh, precision=hp)
        o = o.transpose(0, 2, 1, 3).reshape(B, S, D)
        o = jnp.einsum("bsd,de->bse", o, params["wo"][l], precision=hp) + params["bo"][l][None]
        h = _layer_norm_ref(h + o, params["ln1_w"][l][None], params["ln1_b"][l][None])
        ff = jnp.einsum("bsd,df->bsf", h, params["w1"][l], precision=hp) + params["b1"][l][None]
        ff = jax.nn.gelu(ff, approximate=False)
        ff = jnp.einsum("bsf,fd->bsd", ff, params["w2"][l], precision=hp) + params["b2"][l][None]
        h = _layer_norm_ref(h + ff, params["ln2_w"][l][None], params["ln2_b"][l][None])
    return jnp.einsum("bsd,dp->bsp", h, params["wd"], precision=hp) + params["bd"][None]


if __name__ == "__main__":
    B, S = 2, 8
    D_MODEL, NHEAD, NUM_LAYERS, DIM_FF = 32, 4, 2, 64

    key = jax.random.PRNGKey(0)
    kx, kp = jax.random.split(key)
    x = jax.random.normal(kx, (B, S, INPUT_CHANNELS), dtype=jnp.float32)
    params = init_params(kp, D_MODEL, NUM_LAYERS, DIM_FF)
    pe = positional_encoding(D_MODEL, max_len=20)[:S]

    out = transformer_morph_forward(x, params, pe, nhead=NHEAD)
    out = jax.block_until_ready(out)

    ref = jax.block_until_ready(reference_forward(x, params, pe, nhead=NHEAD))
    assert out.shape == (B, S, PARTS_MAPPING_LEN)
    assert bool(jnp.all(jnp.isfinite(out)))
    # Tolerance absorbs: default MXU precision (vs HIGHEST reference), tanh-form
    # GELU (vs exact erf), approx-reciprocal softmax, single-pass LayerNorm.
    max_err = float(jnp.max(jnp.abs(out - ref)))
    assert max_err < 5e-2, f"mismatch vs reference: {max_err}"
    print("KERNEL_OK")
</pallas_src>

<mosaic_0001>
module attributes {stable_mosaic.version = 11 : i64} {
  func.func @kernel(%arg0: memref<16x64xf32, #tpu.memory_space<vmem>>, %arg1: memref<8x32xf32, #tpu.memory_space<vmem>>, %arg2: memref<64x32xf32, #tpu.memory_space<vmem>>, %arg3: memref<2x32x384xf32, #tpu.memory_space<vmem>>, %arg4: memref<2x64x32xf32, #tpu.memory_space<vmem>>, %arg5: memref<2x8x128xf32, #tpu.memory_space<vmem>>, %arg6: memref<40x128xf32, #tpu.memory_space<vmem>>, %arg7: memref<16x128xf32, #tpu.memory_space<vmem>>) attributes {dimension_semantics = [], scalar_prefetch = 0 : i64, scratch_operands = 0 : i64, tpu.core_type = #tpu.core_type<tc>} {
    %c0 = arith.constant 0 : index
    %c0_0 = arith.constant 0 : index
    %0 = vector.load %arg0[%c0, %c0_0] : memref<16x64xf32, #tpu.memory_space<vmem>>, vector<16x64xf32>
    %c0_1 = arith.constant 0 : index
    %c0_2 = arith.constant 0 : index
    %1 = vector.load %arg2[%c0_1, %c0_2] : memref<64x32xf32, #tpu.memory_space<vmem>>, vector<64x32xf32>
    %cst = arith.constant dense<0.000000e+00> : vector<16x32xf32>
    %2 = tpu.matmul %0, %1, %cst {dimension_numbers = #tpu.dot_dimension_numbers<[1], [0], [0], [1], [0, 0, 1, 1], [], []>} : vector<16x64xf32>, vector<64x32xf32>, vector<16x32xf32> -> vector<16x32xf32>
    %3 = vector.shape_cast %2 : vector<16x32xf32> to vector<2x8x32xf32>
    %c0_3 = arith.constant 0 : index
    %c0_4 = arith.constant 0 : index
    %4 = vector.load %arg1[%c0_3, %c0_4] : memref<8x32xf32, #tpu.memory_space<vmem>>, vector<8x32xf32>
    %5 = vector.shape_cast %4 : vector<8x32xf32> to vector<1x8x32xf32>
    %6 = vector.broadcast %5 : vector<1x8x32xf32> to vector<2x8x32xf32>
    %7 = arith.addf %3, %6 : vector<2x8x32xf32>
    %8 = vector.shape_cast %7 : vector<2x8x32xf32> to vector<16x32xf32>
    %c0_5 = arith.constant 0 : index
    %c0_6 = arith.constant 0 : index
    %c0_7 = arith.constant 0 : index
    %9 = vector.load %arg3[%c0_5, %c0_6, %c0_7] : memref<2x32x384xf32, #tpu.memory_space<vmem>>, vector<1x32x384xf32>
    %10 = vector.shape_cast %9 : vector<1x32x384xf32> to vector<32x384xf32>
    %c0_8 = arith.constant 0 : index
    %c0_9 = arith.constant 0 : index
    %c0_10 = arith.constant 0 : index
    %11 = vector.load %arg5[%c0_8, %c0_9, %c0_10] : memref<2x8x128xf32, #tpu.memory_space<vmem>>, vector<1x8x128xf32>
    %12 = vector.shape_cast %11 : vector<1x8x128xf32> to vector<8x128xf32>
    %13 = vector.extract_strided_slice %10 {offsets = [0, 0], sizes = [32, 96], strides = [1, 1]} : vector<32x384xf32> to vector<32x96xf32>
    %cst_11 = arith.constant dense<0.000000e+00> : vector<16x96xf32>
    %14 = tpu.matmul %8, %13, %cst_11 {dimension_numbers = #tpu.dot_dimension_numbers<[1], [0], [0], [1], [0, 0, 1, 1], [], []>} : vector<16x32xf32>, vector<32x96xf32>, vector<16x96xf32> -> vector<16x96xf32>
    %15 = vector.extract_strided_slice %12 {offsets = [0, 0], sizes = [1, 96], strides = [1, 1]} : vector<8x128xf32> to vector<1x96xf32>
    %16 = vector.broadcast %15 : vector<1x96xf32> to vector<16x96xf32>
    %17 = arith.addf %14, %16 : vector<16x96xf32>
    %18 = vector.shape_cast %17 : vector<16x96xf32> to vector<2x8x96xf32>
    %19 = vector.extract_strided_slice %18 {offsets = [0, 0, 0], sizes = [2, 8, 8], strides = [1, 1, 1]} : vector<2x8x96xf32> to vector<2x8x8xf32>
    %20 = vector.extract_strided_slice %18 {offsets = [0, 0, 32], sizes = [2, 8, 8], strides = [1, 1, 1]} : vector<2x8x96xf32> to vector<2x8x8xf32>
    %21 = vector.extract_strided_slice %18 {offsets = [0, 0, 64], sizes = [2, 8, 8], strides = [1, 1, 1]} : vector<2x8x96xf32> to vector<2x8x8xf32>
    "tpu.trace_start"() <{level = 10 : i32, message = "bqd,bkd->bqk"}> : () -> ()
    %cst_12 = arith.constant dense<0.000000e+00> : vector<2x8x8xf32>
    %22 = tpu.matmul %19, %20, %cst_12 {dimension_numbers = #tpu.dot_dimension_numbers<[2], [2], [1], [1], [0, 0, 0, 1, 1, 1], [0], [0]>} : vector<2x8x8xf32>, vector<2x8x8xf32>, vector<2x8x8xf32> -> vector<2x8x8xf32>
    "tpu.trace_stop"() : () -> ()
    %cst_13 = arith.constant dense<0xFF800000> : vector<2x8xf32>
    %23 = vector.multi_reduction <maximumf>, %22, %cst_13 [2] : vector<2x8x8xf32> to vector<2x8xf32>
    %24 = vector.shape_cast %23 : vector<2x8xf32> to vector<2x8x1xf32>
    %25 = vector.broadcast %24 : vector<2x8x1xf32> to vector<2x8x8xf32>
    %26 = arith.subf %22, %25 : vector<2x8x8xf32>
    %27 = math.exp %26 : vector<2x8x8xf32>
    %cst_14 = arith.constant dense<0.000000e+00> : vector<2x8xf32>
    %28 = vector.multi_reduction <add>, %27, %cst_14 [2] : vector<2x8x8xf32> to vector<2x8xf32>
    %29 = vector.shape_cast %28 : vector<2x8xf32> to vector<2x8x1xf32>
    %30 = tpu.reciprocal %29 {approx = true} : vector<2x8x1xf32> -> vector<2x8x1xf32>
    %31 = vector.broadcast %30 : vector<2x8x1xf32> to vector<2x8x8xf32>
    %32 = arith.mulf %27, %31 : vector<2x8x8xf32>
    "tpu.trace_start"() <{level = 10 : i32, message = "bqk,bkd->bqd"}> : () -> ()
    %cst_15 = arith.constant dense<0.000000e+00> : vector<2x8x8xf32>
    %33 = tpu.matmul %32, %21, %cst_15 {dimension_numbers = #tpu.dot_dimension_numbers<[2], [1], [1], [2], [0, 0, 0, 1, 1, 2], [0], [0]>} : vector<2x8x8xf32>, vector<2x8x8xf32>, vector<2x8x8xf32> -> vector<2x8x8xf32>
    "tpu.trace_stop"() : () -> ()
    %34 = vector.extract_strided_slice %18 {offsets = [0, 0, 8], sizes = [2, 8, 8], strides = [1, 1, 1]} : vector<2x8x96xf32> to vector<2x8x8xf32>
    %35 = vector.extract_strided_slice %18 {offsets = [0, 0, 40], sizes = [2, 8, 8], strides = [1, 1, 1]} : vector<2x8x96xf32> to vector<2x8x8xf32>
    %36 = vector.extract_strided_slice %18 {offsets = [0, 0, 72], sizes = [2, 8, 8], strides = [1, 1, 1]} : vector<2x8x96xf32> to vector<2x8x8xf32>
    "tpu.trace_start"() <{level = 10 : i32, message = "bqd,bkd->bqk"}> : () -> ()
    %cst_16 = arith.constant dense<0.000000e+00> : vector<2x8x8xf32>
    %37 = tpu.matmul %34, %35, %cst_16 {dimension_numbers = #tpu.dot_dimension_numbers<[2], [2], [1], [1], [0, 0, 0, 1, 1, 1], [0], [0]>} : vector<2x8x8xf32>, vector<2x8x8xf32>, vector<2x8x8xf32> -> vector<2x8x8xf32>
    "tpu.trace_stop"() : () -> ()
    %cst_17 = arith.constant dense<0xFF800000> : vector<2x8xf32>
    %38 = vector.multi_reduction <maximumf>, %37, %cst_17 [2] : vector<2x8x8xf32> to vector<2x8xf32>
    %39 = vector.shape_cast %38 : vector<2x8xf32> to vector<2x8x1xf32>
    %40 = vector.broadcast %39 : vector<2x8x1xf32> to vector<2x8x8xf32>
    %41 = arith.subf %37, %40 : vector<2x8x8xf32>
    %42 = math.exp %41 : vector<2x8x8xf32>
    %cst_18 = arith.constant dense<0.000000e+00> : vector<2x8xf32>
    %43 = vector.multi_reduction <add>, %42, %cst_18 [2] : vector<2x8x8xf32> to vector<2x8xf32>
    %44 = vector.shape_cast %43 : vector<2x8xf32> to vector<2x8x1xf32>
    %45 = tpu.reciprocal %44 {approx = true} : vector<2x8x1xf32> -> vector<2x8x1xf32>
    %46 = vector.broadcast %45 : vector<2x8x1xf32> to vector<2x8x8xf32>
    %47 = arith.mulf %42, %46 : vector<2x8x8xf32>
    "tpu.trace_start"() <{level = 10 : i32, message = "bqk,bkd->bqd"}> : () -> ()
    %cst_19 = arith.constant dense<0.000000e+00> : vector<2x8x8xf32>
    %48 = tpu.matmul %47, %36, %cst_19 {dimension_numbers = #tpu.dot_dimension_numbers<[2], [1], [1], [2], [0, 0, 0, 1, 1, 2], [0], [0]>} : vector<2x8x8xf32>, vector<2x8x8xf32>, vector<2x8x8xf32> -> vector<2x8x8xf32>
    "tpu.trace_stop"() : () -> ()
    %49 = vector.extract_strided_slice %18 {offsets = [0, 0, 16], sizes = [2, 8, 8], strides = [1, 1, 1]} : vector<2x8x96xf32> to vector<2x8x8xf32>
    %50 = vector.extract_strided_slice %18 {offsets = [0, 0, 48], sizes = [2, 8, 8], strides = [1, 1, 1]} : vector<2x8x96xf32> to vector<2x8x8xf32>
    %51 = vector.extract_strided_slice %18 {offsets = [0, 0, 80], sizes = [2, 8, 8], strides = [1, 1, 1]} : vector<2x8x96xf32> to vector<2x8x8xf32>
    "tpu.trace_start"() <{level = 10 : i32, message = "bqd,bkd->bqk"}> : () -> ()
    %cst_20 = arith.constant dense<0.000000e+00> : vector<2x8x8xf32>
    %52 = tpu.matmul %49, %50, %cst_20 {dimension_numbers = #tpu.dot_dimension_numbers<[2], [2], [1], [1], [0, 0, 0, 1, 1, 1], [0], [0]>} : vector<2x8x8xf32>, vector<2x8x8xf32>, vector<2x8x8xf32> -> vector<2x8x8xf32>
    "tpu.trace_stop"() : () -> ()
    %cst_21 = arith.constant dense<0xFF800000> : vector<2x8xf32>
    %53 = vector.multi_reduction <maximumf>, %52, %cst_21 [2] : vector<2x8x8xf32> to vector<2x8xf32>
    %54 = vector.shape_cast %53 : vector<2x8xf32> to vector<2x8x1xf32>
    %55 = vector.broadcast %54 : vector<2x8x1xf32> to vector<2x8x8xf32>
    %56 = arith.subf %52, %55 : vector<2x8x8xf32>
    %57 = math.exp %56 : vector<2x8x8xf32>
    %cst_22 = arith.constant dense<0.000000e+00> : vector<2x8xf32>
    %58 = vector.multi_reduction <add>, %57, %cst_22 [2] : vector<2x8x8xf32> to vector<2x8xf32>
    %59 = vector.shape_cast %58 : vector<2x8xf32> to vector<2x8x1xf32>
    %60 = tpu.reciprocal %59 {approx = true} : vector<2x8x1xf32> -> vector<2x8x1xf32>
    %61 = vector.broadcast %60 : vector<2x8x1xf32> to vector<2x8x8xf32>
    %62 = arith.mulf %57, %61 : vector<2x8x8xf32>
    "tpu.trace_start"() <{level = 10 : i32, message = "bqk,bkd->bqd"}> : () -> ()
    %cst_23 = arith.constant dense<0.000000e+00> : vector<2x8x8xf32>
    %63 = tpu.matmul %62, %51, %cst_23 {dimension_numbers = #tpu.dot_dimension_numbers<[2], [1], [1], [2], [0, 0, 0, 1, 1, 2], [0], [0]>} : vector<2x8x8xf32>, vector<2x8x8xf32>, vector<2x8x8xf32> -> vector<2x8x8xf32>
    "tpu.trace_stop"() : () -> ()
    %64 = vector.extract_strided_slice %18 {offsets = [0, 0, 24], sizes = [2, 8, 8], strides = [1, 1, 1]} : vector<2x8x96xf32> to vector<2x8x8xf32>
    %65 = vector.extract_strided_slice %18 {offsets = [0, 0, 56], sizes = [2, 8, 8], strides = [1, 1, 1]} : vector<2x8x96xf32> to vector<2x8x8xf32>
    %66 = vector.extract_strided_slice %18 {offsets = [0, 0, 88], sizes = [2, 8, 8], strides = [1, 1, 1]} : vector<2x8x96xf32> to vector<2x8x8xf32>
    "tpu.trace_start"() <{level = 10 : i32, message = "bqd,bkd->bqk"}> : () -> ()
    %cst_24 = arith.constant dense<0.000000e+00> : vector<2x8x8xf32>
    %67 = tpu.matmul %64, %65, %cst_24 {dimension_numbers = #tpu.dot_dimension_numbers<[2], [2], [1], [1], [0, 0, 0, 1, 1, 1], [0], [0]>} : vector<2x8x8xf32>, vector<2x8x8xf32>, vector<2x8x8xf32> -> vector<2x8x8xf32>
    "tpu.trace_stop"() : () -> ()
    %cst_25 = arith.constant dense<0xFF800000> : vector<2x8xf32>
    %68 = vector.multi_reduction <maximumf>, %67, %cst_25 [2] : vector<2x8x8xf32> to vector<2x8xf32>
    %69 = vector.shape_cast %68 : vector<2x8xf32> to vector<2x8x1xf32>
    %70 = vector.broadcast %69 : vector<2x8x1xf32> to vector<2x8x8xf32>
    %71 = arith.subf %67, %70 : vector<2x8x8xf32>
    %72 = math.exp %71 : vector<2x8x8xf32>
    %cst_26 = arith.constant dense<0.000000e+00> : vector<2x8xf32>
    %73 = vector.multi_reduction <add>, %72, %cst_26 [2] : vector<2x8x8xf32> to vector<2x8xf32>
    %74 = vector.shape_cast %73 : vector<2x8xf32> to vector<2x8x1xf32>
    %75 = tpu.reciprocal %74 {approx = true} : vector<2x8x1xf32> -> vector<2x8x1xf32>
    %76 = vector.broadcast %75 : vector<2x8x1xf32> to vector<2x8x8xf32>
    %77 = arith.mulf %72, %76 : vector<2x8x8xf32>
    "tpu.trace_start"() <{level = 10 : i32, message = "bqk,bkd->bqd"}> : () -> ()
    %cst_27 = arith.constant dense<0.000000e+00> : vector<2x8x8xf32>
    %78 = tpu.matmul %77, %66, %cst_27 {dimension_numbers = #tpu.dot_dimension_numbers<[2], [1], [1], [2], [0, 0, 0, 1, 1, 2], [0], [0]>} : vector<2x8x8xf32>, vector<2x8x8xf32>, vector<2x8x8xf32> -> vector<2x8x8xf32>
    "tpu.trace_stop"() : () -> ()
    %79 = tpu.concatenate %33, %48, %63, %78 in 2 : vector<2x8x8xf32>, vector<2x8x8xf32>, vector<2x8x8xf32>, vector<2x8x8xf32> -> vector<2x8x32xf32>
    %80 = vector.shape_cast %79 : vector<2x8x32xf32> to vector<16x32xf32>
    %81 = vector.extract_strided_slice %10 {offsets = [0, 128], sizes = [32, 32], strides = [1, 1]} : vector<32x384xf32> to vector<32x32xf32>
    %cst_28 = arith.constant dense<0.000000e+00> : vector<16x32xf32>
    %82 = tpu.matmul %80, %81, %cst_28 {dimension_numbers = #tpu.dot_dimension_numbers<[1], [0], [0], [1], [0, 0, 1, 1], [], []>} : vector<16x32xf32>, vector<32x32xf32>, vector<16x32xf32> -> vector<16x32xf32>
    %83 = vector.extract_strided_slice %12 {offsets = [1, 0], sizes = [1, 32], strides = [1, 1]} : vector<8x128xf32> to vector<1x32xf32>
    %84 = vector.broadcast %83 : vector<1x32xf32> to vector<16x32xf32>
    %85 = arith.addf %82, %84 : vector<16x32xf32>
    %86 = arith.addf %8, %85 : vector<16x32xf32>
    %87 = vector.extract_strided_slice %12 {offsets = [2, 0], sizes = [1, 32], strides = [1, 1]} : vector<8x128xf32> to vector<1x32xf32>
    %88 = vector.extract_strided_slice %12 {offsets = [3, 0], sizes = [1, 32], strides = [1, 1]} : vector<8x128xf32> to vector<1x32xf32>
    %cst_29 = arith.constant dense<0.000000e+00> : vector<16xf32>
    %89 = vector.multi_reduction <add>, %86, %cst_29 [1] : vector<16x32xf32> to vector<16xf32>
    %90 = vector.shape_cast %89 : vector<16xf32> to vector<16x1xf32>
    %cst_30 = arith.constant 3.200000e+01 : f32
    %91 = vector.broadcast %cst_30 : f32 to vector<16x1xf32>
    %92 = arith.divf %90, %91 : vector<16x1xf32>
    %93 = arith.mulf %86, %86 : vector<16x32xf32>
    %cst_31 = arith.constant dense<0.000000e+00> : vector<16xf32>
    %94 = vector.multi_reduction <add>, %93, %cst_31 [1] : vector<16x32xf32> to vector<16xf32>
    %95 = vector.shape_cast %94 : vector<16xf32> to vector<16x1xf32>
    %cst_32 = arith.constant 3.200000e+01 : f32
    %96 = vector.broadcast %cst_32 : f32 to vector<16x1xf32>
    %97 = arith.divf %95, %96 : vector<16x1xf32>
    %98 = arith.mulf %92, %92 : vector<16x1xf32>
    %99 = arith.subf %97, %98 : vector<16x1xf32>
    %cst_33 = arith.constant 0.000000e+00 : f32
    %100 = vector.broadcast %cst_33 : f32 to vector<16x1xf32>
    %101 = arith.maximumf %99, %100 : vector<16x1xf32>
    %102 = vector.broadcast %92 : vector<16x1xf32> to vector<16x32xf32>
    %103 = arith.subf %86, %102 : vector<16x32xf32>
    %cst_34 = arith.constant 9.99999974E-6 : f32
    %104 = vector.broadcast %cst_34 : f32 to vector<16x1xf32>
    %105 = arith.addf %101, %104 : vector<16x1xf32>
    %106 = math.rsqrt %105 : vector<16x1xf32>
    %107 = vector.broadcast %106 : vector<16x1xf32> to vector<16x32xf32>
    %108 = arith.mulf %103, %107 : vector<16x32xf32>
    %109 = vector.broadcast %87 : vector<1x32xf32> to vector<16x32xf32>
    %110 = arith.mulf %108, %109 : vector<16x32xf32>
    %111 = vector.broadcast %88 : vector<1x32xf32> to vector<16x32xf32>
    %112 = arith.addf %110, %111 : vector<16x32xf32>
    %113 = vector.extract_strided_slice %10 {offsets = [0, 256], sizes = [32, 64], strides = [1, 1]} : vector<32x384xf32> to vector<32x64xf32>
    %cst_35 = arith.constant dense<0.000000e+00> : vector<16x64xf32>
    %114 = tpu.matmul %112, %113, %cst_35 {dimension_numbers = #tpu.dot_dimension_numbers<[1], [0], [0], [1], [0, 0, 1, 1], [], []>} : vector<16x32xf32>, vector<32x64xf32>, vector<16x64xf32> -> vector<16x64xf32>
    %115 = vector.extract_strided_slice %12 {offsets = [4, 0], sizes = [1, 64], strides = [1, 1]} : vector<8x128xf32> to vector<1x64xf32>
    %116 = vector.broadcast %115 : vector<1x64xf32> to vector<16x64xf32>
    %117 = arith.addf %114, %116 : vector<16x64xf32>
    %cst_36 = arith.constant 5.000000e-01 : f32
    %118 = vector.broadcast %cst_36 : f32 to vector<16x64xf32>
    %119 = arith.mulf %118, %117 : vector<16x64xf32>
    %cst_37 = arith.constant 4.471500e-02 : f32
    %120 = vector.broadcast %cst_37 : f32 to vector<16x64xf32>
    %121 = arith.mulf %120, %117 : vector<16x64xf32>
    %122 = arith.mulf %121, %117 : vector<16x64xf32>
    %123 = arith.mulf %122, %117 : vector<16x64xf32>
    %124 = arith.addf %117, %123 : vector<16x64xf32>
    %cst_38 = arith.constant 0.797884583 : f32
    %125 = vector.broadcast %cst_38 : f32 to vector<16x64xf32>
    %126 = arith.mulf %125, %124 : vector<16x64xf32>
    %127 = math.tanh %126 : vector<16x64xf32>
    %cst_39 = arith.constant 1.000000e+00 : f32
    %128 = vector.broadcast %cst_39 : f32 to vector<16x64xf32>
    %129 = arith.addf %128, %127 : vector<16x64xf32>
    %130 = arith.mulf %119, %129 : vector<16x64xf32>
    %c0_40 = arith.constant 0 : index
    %c0_41 = arith.constant 0 : index
    %c0_42 = arith.constant 0 : index
    %131 = vector.load %arg4[%c0_40, %c0_41, %c0_42] : memref<2x64x32xf32, #tpu.memory_space<vmem>>, vector<1x64x32xf32>
    %132 = vector.shape_cast %131 : vector<1x64x32xf32> to vector<64x32xf32>
    %cst_43 = arith.constant dense<0.000000e+00> : vector<16x32xf32>
    %133 = tpu.matmul %130, %132, %cst_43 {dimension_numbers = #tpu.dot_dimension_numbers<[1], [0], [0], [1], [0, 0, 1, 1], [], []>} : vector<16x64xf32>, vector<64x32xf32>, vector<16x32xf32> -> vector<16x32xf32>
    %134 = vector.extract_strided_slice %12 {offsets = [5, 0], sizes = [1, 32], strides = [1, 1]} : vector<8x128xf32> to vector<1x32xf32>
    %135 = vector.broadcast %134 : vector<1x32xf32> to vector<16x32xf32>
    %136 = arith.addf %133, %135 : vector<16x32xf32>
    %137 = arith.addf %112, %136 : vector<16x32xf32>
    %138 = vector.extract_strided_slice %12 {offsets = [6, 0], sizes = [1, 32], strides = [1, 1]} : vector<8x128xf32> to vector<1x32xf32>
    %139 = vector.extract_strided_slice %12 {offsets = [7, 0], sizes = [1, 32], strides = [1, 1]} : vector<8x128xf32> to vector<1x32xf32>
    %cst_44 = arith.constant dense<0.000000e+00> : vector<16xf32>
    %140 = vector.multi_reduction <add>, %137, %cst_44 [1] : vector<16x32xf32> to vector<16xf32>
    %141 = vector.shape_cast %140 : vector<16xf32> to vector<16x1xf32>
    %cst_45 = arith.constant 3.200000e+01 : f32
    %142 = vector.broadcast %cst_45 : f32 to vector<16x1xf32>
    %143 = arith.divf %141, %142 : vector<16x1xf32>
    %144 = arith.mulf %137, %137 : vector<16x32xf32>
    %cst_46 = arith.constant dense<0.000000e+00> : vector<16xf32>
    %145 = vector.multi_reduction <add>, %144, %cst_46 [1] : vector<16x32xf32> to vector<16xf32>
    %146 = vector.shape_cast %145 : vector<16xf32> to vector<16x1xf32>
    %cst_47 = arith.constant 3.200000e+01 : f32
    %147 = vector.broadcast %cst_47 : f32 to vector<16x1xf32>
    %148 = arith.divf %146, %147 : vector<16x1xf32>
    %149 = arith.mulf %143, %143 : vector<16x1xf32>
    %150 = arith.subf %148, %149 : vector<16x1xf32>
    %cst_48 = arith.constant 0.000000e+00 : f32
    %151 = vector.broadcast %cst_48 : f32 to vector<16x1xf32>
    %152 = arith.maximumf %150, %151 : vector<16x1xf32>
    %153 = vector.broadcast %143 : vector<16x1xf32> to vector<16x32xf32>
    %154 = arith.subf %137, %153 : vector<16x32xf32>
    %cst_49 = arith.constant 9.99999974E-6 : f32
    %155 = vector.broadcast %cst_49 : f32 to vector<16x1xf32>
    %156 = arith.addf %152, %155 : vector<16x1xf32>
    %157 = math.rsqrt %156 : vector<16x1xf32>
    %158 = vector.broadcast %157 : vector<16x1xf32> to vector<16x32xf32>
    %159 = arith.mulf %154, %158 : vector<16x32xf32>
    %160 = vector.broadcast %138 : vector<1x32xf32> to vector<16x32xf32>
    %161 = arith.mulf %159, %160 : vector<16x32xf32>
    %162 = vector.broadcast %139 : vector<1x32xf32> to vector<16x32xf32>
    %163 = arith.addf %161, %162 : vector<16x32xf32>
    %c1 = arith.constant 1 : index
    %c0_50 = arith.constant 0 : index
    %c0_51 = arith.constant 0 : index
    %164 = vector.load %arg3[%c1, %c0_50, %c0_51] : memref<2x32x384xf32, #tpu.memory_space<vmem>>, vector<1x32x384xf32>
    %165 = vector.shape_cast %164 : vector<1x32x384xf32> to vector<32x384xf32>
    %c1_52 = arith.constant 1 : index
    %c0_53 = arith.constant 0 : index
    %c0_54 = arith.constant 0 : index
    %166 = vector.load %arg5[%c1_52, %c0_53, %c0_54] : memref<2x8x128xf32, #tpu.memory_space<vmem>>, vector<1x8x128xf32>
    %167 = vector.shape_cast %166 : vector<1x8x128xf32> to vector<8x128xf32>
    %168 = vector.extract_strided_slice %165 {offsets = [0, 0], sizes = [32, 96], strides = [1, 1]} : vector<32x384xf32> to vector<32x96xf32>
    %cst_55 = arith.constant dense<0.000000e+00> : vector<16x96xf32>
    %169 = tpu.matmul %163, %168, %cst_55 {dimension_numbers = #tpu.dot_dimension_numbers<[1], [0], [0], [1], [0, 0, 1, 1], [], []>} : vector<16x32xf32>, vector<32x96xf32>, vector<16x96xf32> -> vector<16x96xf32>
    %170 = vector.extract_strided_slice %167 {offsets = [0, 0], sizes = [1, 96], strides = [1, 1]} : vector<8x128xf32> to vector<1x96xf32>
    %171 = vector.broadcast %170 : vector<1x96xf32> to vector<16x96xf32>
    %172 = arith.addf %169, %171 : vector<16x96xf32>
    %173 = vector.shape_cast %172 : vector<16x96xf32> to vector<2x8x96xf32>
    %174 = vector.extract_strided_slice %173 {offsets = [0, 0, 0], sizes = [2, 8, 8], strides = [1, 1, 1]} : vector<2x8x96xf32> to vector<2x8x8xf32>
    %175 = vector.extract_strided_slice %173 {offsets = [0, 0, 32], sizes = [2, 8, 8], strides = [1, 1, 1]} : vector<2x8x96xf32> to vector<2x8x8xf32>
    %176 = vector.extract_strided_slice %173 {offsets = [0, 0, 64], sizes = [2, 8, 8], strides = [1, 1, 1]} : vector<2x8x96xf32> to vector<2x8x8xf32>
    "tpu.trace_start"() <{level = 10 : i32, message = "bqd,bkd->bqk"}> : () -> ()
    %cst_56 = arith.constant dense<0.000000e+00> : vector<2x8x8xf32>
    %177 = tpu.matmul %174, %175, %cst_56 {dimension_numbers = #tpu.dot_dimension_numbers<[2], [2], [1], [1], [0, 0, 0, 1, 1, 1], [0], [0]>} : vector<2x8x8xf32>, vector<2x8x8xf32>, vector<2x8x8xf32> -> vector<2x8x8xf32>
    "tpu.trace_stop"() : () -> ()
    %cst_57 = arith.constant dense<0xFF800000> : vector<2x8xf32>
    %178 = vector.multi_reduction <maximumf>, %177, %cst_57 [2] : vector<2x8x8xf32> to vector<2x8xf32>
    %179 = vector.shape_cast %178 : vector<2x8xf32> to vector<2x8x1xf32>
    %180 = vector.broadcast %179 : vector<2x8x1xf32> to vector<2x8x8xf32>
    %181 = arith.subf %177, %180 : vector<2x8x8xf32>
    %182 = math.exp %181 : vector<2x8x8xf32>
    %cst_58 = arith.constant dense<0.000000e+00> : vector<2x8xf32>
    %183 = vector.multi_reduction <add>, %182, %cst_58 [2] : vector<2x8x8xf32> to vector<2x8xf32>
    %184 = vector.shape_cast %183 : vector<2x8xf32> to vector<2x8x1xf32>
    %185 = tpu.reciprocal %184 {approx = true} : vector<2x8x1xf32> -> vector<2x8x1xf32>
    %186 = vector.broadcast %185 : vector<2x8x1xf32> to vector<2x8x8xf32>
    %187 = arith.mulf %182, %186 : vector<2x8x8xf32>
    "tpu.trace_start"() <{level = 10 : i32, message = "bqk,bkd->bqd"}> : () -> ()
    %cst_59 = arith.constant dense<0.000000e+00> : vector<2x8x8xf32>
    %188 = tpu.matmul %187, %176, %cst_59 {dimension_numbers = #tpu.dot_dimension_numbers<[2], [1], [1], [2], [0, 0, 0, 1, 1, 2], [0], [0]>} : vector<2x8x8xf32>, vector<2x8x8xf32>, vector<2x8x8xf32> -> vector<2x8x8xf32>
    "tpu.trace_stop"() : () -> ()
    %189 = vector.extract_strided_slice %173 {offsets = [0, 0, 8], sizes = [2, 8, 8], strides = [1, 1, 1]} : vector<2x8x96xf32> to vector<2x8x8xf32>
    %190 = vector.extract_strided_slice %173 {offsets = [0, 0, 40], sizes = [2, 8, 8], strides = [1, 1, 1]} : vector<2x8x96xf32> to vector<2x8x8xf32>
    %191 = vector.extract_strided_slice %173 {offsets = [0, 0, 72], sizes = [2, 8, 8], strides = [1, 1, 1]} : vector<2x8x96xf32> to vector<2x8x8xf32>
    "tpu.trace_start"() <{level = 10 : i32, message = "bqd,bkd->bqk"}> : () -> ()
    %cst_60 = arith.constant dense<0.000000e+00> : vector<2x8x8xf32>
    %192 = tpu.matmul %189, %190, %cst_60 {dimension_numbers = #tpu.dot_dimension_numbers<[2], [2], [1], [1], [0, 0, 0, 1, 1, 1], [0], [0]>} : vector<2x8x8xf32>, vector<2x8x8xf32>, vector<2x8x8xf32> -> vector<2x8x8xf32>
    "tpu.trace_stop"() : () -> ()
    %cst_61 = arith.constant dense<0xFF800000> : vector<2x8xf32>
    %193 = vector.multi_reduction <maximumf>, %192, %cst_61 [2] : vector<2x8x8xf32> to vector<2x8xf32>
    %194 = vector.shape_cast %193 : vector<2x8xf32> to vector<2x8x1xf32>
    %195 = vector.broadcast %194 : vector<2x8x1xf32> to vector<2x8x8xf32>
    %196 = arith.subf %192, %195 : vector<2x8x8xf32>
    %197 = math.exp %196 : vector<2x8x8xf32>
    %cst_62 = arith.constant dense<0.000000e+00> : vector<2x8xf32>
    %198 = vector.multi_reduction <add>, %197, %cst_62 [2] : vector<2x8x8xf32> to vector<2x8xf32>
    %199 = vector.shape_cast %198 : vector<2x8xf32> to vector<2x8x1xf32>
    %200 = tpu.reciprocal %199 {approx = true} : vector<2x8x1xf32> -> vector<2x8x1xf32>
    %201 = vector.broadcast %200 : vector<2x8x1xf32> to vector<2x8x8xf32>
    %202 = arith.mulf %197, %201 : vector<2x8x8xf32>
    "tpu.trace_start"() <{level = 10 : i32, message = "bqk,bkd->bqd"}> : () -> ()
    %cst_63 = arith.constant dense<0.000000e+00> : vector<2x8x8xf32>
    %203 = tpu.matmul %202, %191, %cst_63 {dimension_numbers = #tpu.dot_dimension_numbers<[2], [1], [1], [2], [0, 0, 0, 1, 1, 2], [0], [0]>} : vector<2x8x8xf32>, vector<2x8x8xf32>, vector<2x8x8xf32> -> vector<2x8x8xf32>
    "tpu.trace_stop"() : () -> ()
    %204 = vector.extract_strided_slice %173 {offsets = [0, 0, 16], sizes = [2, 8, 8], strides = [1, 1, 1]} : vector<2x8x96xf32> to vector<2x8x8xf32>
    %205 = vector.extract_strided_slice %173 {offsets = [0, 0, 48], sizes = [2, 8, 8], strides = [1, 1, 1]} : vector<2x8x96xf32> to vector<2x8x8xf32>
    %206 = vector.extract_strided_slice %173 {offsets = [0, 0, 80], sizes = [2, 8, 8], strides = [1, 1, 1]} : vector<2x8x96xf32> to vector<2x8x8xf32>
    "tpu.trace_start"() <{level = 10 : i32, message = "bqd,bkd->bqk"}> : () -> ()
    %cst_64 = arith.constant dense<0.000000e+00> : vector<2x8x8xf32>
    %207 = tpu.matmul %204, %205, %cst_64 {dimension_numbers = #tpu.dot_dimension_numbers<[2], [2], [1], [1], [0, 0, 0, 1, 1, 1], [0], [0]>} : vector<2x8x8xf32>, vector<2x8x8xf32>, vector<2x8x8xf32> -> vector<2x8x8xf32>
    "tpu.trace_stop"() : () -> ()
    %cst_65 = arith.constant dense<0xFF800000> : vector<2x8xf32>
    %208 = vector.multi_reduction <maximumf>, %207, %cst_65 [2] : vector<2x8x8xf32> to vector<2x8xf32>
    %209 = vector.shape_cast %208 : vector<2x8xf32> to vector<2x8x1xf32>
    %210 = vector.broadcast %209 : vector<2x8x1xf32> to vector<2x8x8xf32>
    %211 = arith.subf %207, %210 : vector<2x8x8xf32>
    %212 = math.exp %211 : vector<2x8x8xf32>
    %cst_66 = arith.constant dense<0.000000e+00> : vector<2x8xf32>
    %213 = vector.multi_reduction <add>, %212, %cst_66 [2] : vector<2x8x8xf32> to vector<2x8xf32>
    %214 = vector.shape_cast %213 : vector<2x8xf32> to vector<2x8x1xf32>
    %215 = tpu.reciprocal %214 {approx = true} : vector<2x8x1xf32> -> vector<2x8x1xf32>
    %216 = vector.broadcast %215 : vector<2x8x1xf32> to vector<2x8x8xf32>
    %217 = arith.mulf %212, %216 : vector<2x8x8xf32>
    "tpu.trace_start"() <{level = 10 : i32, message = "bqk,bkd->bqd"}> : () -> ()
    %cst_67 = arith.constant dense<0.000000e+00> : vector<2x8x8xf32>
    %218 = tpu.matmul %217, %206, %cst_67 {dimension_numbers = #tpu.dot_dimension_numbers<[2], [1], [1], [2], [0, 0, 0, 1, 1, 2], [0], [0]>} : vector<2x8x8xf32>, vector<2x8x8xf32>, vector<2x8x8xf32> -> vector<2x8x8xf32>
    "tpu.trace_stop"() : () -> ()
    %219 = vector.extract_strided_slice %173 {offsets = [0, 0, 24], sizes = [2, 8, 8], strides = [1, 1, 1]} : vector<2x8x96xf32> to vector<2x8x8xf32>
    %220 = vector.extract_strided_slice %173 {offsets = [0, 0, 56], sizes = [2, 8, 8], strides = [1, 1, 1]} : vector<2x8x96xf32> to vector<2x8x8xf32>
    %221 = vector.extract_strided_slice %173 {offsets = [0, 0, 88], sizes = [2, 8, 8], strides = [1, 1, 1]} : vector<2x8x96xf32> to vector<2x8x8xf32>
    "tpu.trace_start"() <{level = 10 : i32, message = "bqd,bkd->bqk"}> : () -> ()
    %cst_68 = arith.constant dense<0.000000e+00> : vector<2x8x8xf32>
    %222 = tpu.matmul %219, %220, %cst_68 {dimension_numbers = #tpu.dot_dimension_numbers<[2], [2], [1], [1], [0, 0, 0, 1, 1, 1], [0], [0]>} : vector<2x8x8xf32>, vector<2x8x8xf32>, vector<2x8x8xf32> -> vector<2x8x8xf32>
    "tpu.trace_stop"() : () -> ()
    %cst_69 = arith.constant dense<0xFF800000> : vector<2x8xf32>
    %223 = vector.multi_reduction <maximumf>, %222, %cst_69 [2] : vector<2x8x8xf32> to vector<2x8xf32>
    %224 = vector.shape_cast %223 : vector<2x8xf32> to vector<2x8x1xf32>
    %225 = vector.broadcast %224 : vector<2x8x1xf32> to vector<2x8x8xf32>
    %226 = arith.subf %222, %225 : vector<2x8x8xf32>
    %227 = math.exp %226 : vector<2x8x8xf32>
    %cst_70 = arith.constant dense<0.000000e+00> : vector<2x8xf32>
    %228 = vector.multi_reduction <add>, %227, %cst_70 [2] : vector<2x8x8xf32> to vector<2x8xf32>
    %229 = vector.shape_cast %228 : vector<2x8xf32> to vector<2x8x1xf32>
    %230 = tpu.reciprocal %229 {approx = true} : vector<2x8x1xf32> -> vector<2x8x1xf32>
    %231 = vector.broadcast %230 : vector<2x8x1xf32> to vector<2x8x8xf32>
    %232 = arith.mulf %227, %231 : vector<2x8x8xf32>
    "tpu.trace_start"() <{level = 10 : i32, message = "bqk,bkd->bqd"}> : () -> ()
    %cst_71 = arith.constant dense<0.000000e+00> : vector<2x8x8xf32>
    %233 = tpu.matmul %232, %221, %cst_71 {dimension_numbers = #tpu.dot_dimension_numbers<[2], [1], [1], [2], [0, 0, 0, 1, 1, 2], [0], [0]>} : vector<2x8x8xf32>, vector<2x8x8xf32>, vector<2x8x8xf32> -> vector<2x8x8xf32>
    "tpu.trace_stop"() : () -> ()
    %234 = tpu.concatenate %188, %203, %218, %233 in 2 : vector<2x8x8xf32>, vector<2x8x8xf32>, vector<2x8x8xf32>, vector<2x8x8xf32> -> vector<2x8x32xf32>
    %235 = vector.shape_cast %234 : vector<2x8x32xf32> to vector<16x32xf32>
    %236 = vector.extract_strided_slice %165 {offsets = [0, 128], sizes = [32, 32], strides = [1, 1]} : vector<32x384xf32> to vector<32x32xf32>
    %cst_72 = arith.constant dense<0.000000e+00> : vector<16x32xf32>
    %237 = tpu.matmul %235, %236, %cst_72 {dimension_numbers = #tpu.dot_dimension_numbers<[1], [0], [0], [1], [0, 0, 1, 1], [], []>} : vector<16x32xf32>, vector<32x32xf32>, vector<16x32xf32> -> vector<16x32xf32>
    %238 = vector.extract_strided_slice %167 {offsets = [1, 0], sizes = [1, 32], strides = [1, 1]} : vector<8x128xf32> to vector<1x32xf32>
    %239 = vector.broadcast %238 : vector<1x32xf32> to vector<16x32xf32>
    %240 = arith.addf %237, %239 : vector<16x32xf32>
    %241 = arith.addf %163, %240 : vector<16x32xf32>
    %242 = vector.extract_strided_slice %167 {offsets = [2, 0], sizes = [1, 32], strides = [1, 1]} : vector<8x128xf32> to vector<1x32xf32>
    %243 = vector.extract_strided_slice %167 {offsets = [3, 0], sizes = [1, 32], strides = [1, 1]} : vector<8x128xf32> to vector<1x32xf32>
    %cst_73 = arith.constant dense<0.000000e+00> : vector<16xf32>
    %244 = vector.multi_reduction <add>, %241, %cst_73 [1] : vector<16x32xf32> to vector<16xf32>
    %245 = vector.shape_cast %244 : vector<16xf32> to vector<16x1xf32>
    %cst_74 = arith.constant 3.200000e+01 : f32
    %246 = vector.broadcast %cst_74 : f32 to vector<16x1xf32>
    %247 = arith.divf %245, %246 : vector<16x1xf32>
    %248 = arith.mulf %241, %241 : vector<16x32xf32>
    %cst_75 = arith.constant dense<0.000000e+00> : vector<16xf32>
    %249 = vector.multi_reduction <add>, %248, %cst_75 [1] : vector<16x32xf32> to vector<16xf32>
    %250 = vector.shape_cast %249 : vector<16xf32> to vector<16x1xf32>
    %cst_76 = arith.constant 3.200000e+01 : f32
    %251 = vector.broadcast %cst_76 : f32 to vector<16x1xf32>
    %252 = arith.divf %250, %251 : vector<16x1xf32>
    %253 = arith.mulf %247, %247 : vector<16x1xf32>
    %254 = arith.subf %252, %253 : vector<16x1xf32>
    %cst_77 = arith.constant 0.000000e+00 : f32
    %255 = vector.broadcast %cst_77 : f32 to vector<16x1xf32>
    %256 = arith.maximumf %254, %255 : vector<16x1xf32>
    %257 = vector.broadcast %247 : vector<16x1xf32> to vector<16x32xf32>
    %258 = arith.subf %241, %257 : vector<16x32xf32>
    %cst_78 = arith.constant 9.99999974E-6 : f32
    %259 = vector.broadcast %cst_78 : f32 to vector<16x1xf32>
    %260 = arith.addf %256, %259 : vector<16x1xf32>
    %261 = math.rsqrt %260 : vector<16x1xf32>
    %262 = vector.broadcast %261 : vector<16x1xf32> to vector<16x32xf32>
    %263 = arith.mulf %258, %262 : vector<16x32xf32>
    %264 = vector.broadcast %242 : vector<1x32xf32> to vector<16x32xf32>
    %265 = arith.mulf %263, %264 : vector<16x32xf32>
    %266 = vector.broadcast %243 : vector<1x32xf32> to vector<16x32xf32>
    %267 = arith.addf %265, %266 : vector<16x32xf32>
    %268 = vector.extract_strided_slice %165 {offsets = [0, 256], sizes = [32, 64], strides = [1, 1]} : vector<32x384xf32> to vector<32x64xf32>
    %cst_79 = arith.constant dense<0.000000e+00> : vector<16x64xf32>
    %269 = tpu.matmul %267, %268, %cst_79 {dimension_numbers = #tpu.dot_dimension_numbers<[1], [0], [0], [1], [0, 0, 1, 1], [], []>} : vector<16x32xf32>, vector<32x64xf32>, vector<16x64xf32> -> vector<16x64xf32>
    %270 = vector.extract_strided_slice %167 {offsets = [4, 0], sizes = [1, 64], strides = [1, 1]} : vector<8x128xf32> to vector<1x64xf32>
    %271 = vector.broadcast %270 : vector<1x64xf32> to vector<16x64xf32>
    %272 = arith.addf %269, %271 : vector<16x64xf32>
    %cst_80 = arith.constant 5.000000e-01 : f32
    %273 = vector.broadcast %cst_80 : f32 to vector<16x64xf32>
    %274 = arith.mulf %273, %272 : vector<16x64xf32>
    %cst_81 = arith.constant 4.471500e-02 : f32
    %275 = vector.broadcast %cst_81 : f32 to vector<16x64xf32>
    %276 = arith.mulf %275, %272 : vector<16x64xf32>
    %277 = arith.mulf %276, %272 : vector<16x64xf32>
    %278 = arith.mulf %277, %272 : vector<16x64xf32>
    %279 = arith.addf %272, %278 : vector<16x64xf32>
    %cst_82 = arith.constant 0.797884583 : f32
    %280 = vector.broadcast %cst_82 : f32 to vector<16x64xf32>
    %281 = arith.mulf %280, %279 : vector<16x64xf32>
    %282 = math.tanh %281 : vector<16x64xf32>
    %cst_83 = arith.constant 1.000000e+00 : f32
    %283 = vector.broadcast %cst_83 : f32 to vector<16x64xf32>
    %284 = arith.addf %283, %282 : vector<16x64xf32>
    %285 = arith.mulf %274, %284 : vector<16x64xf32>
    %c1_84 = arith.constant 1 : index
    %c0_85 = arith.constant 0 : index
    %c0_86 = arith.constant 0 : index
    %286 = vector.load %arg4[%c1_84, %c0_85, %c0_86] : memref<2x64x32xf32, #tpu.memory_space<vmem>>, vector<1x64x32xf32>
    %287 = vector.shape_cast %286 : vector<1x64x32xf32> to vector<64x32xf32>
    %cst_87 = arith.constant dense<0.000000e+00> : vector<16x32xf32>
    %288 = tpu.matmul %285, %287, %cst_87 {dimension_numbers = #tpu.dot_dimension_numbers<[1], [0], [0], [1], [0, 0, 1, 1], [], []>} : vector<16x64xf32>, vector<64x32xf32>, vector<16x32xf32> -> vector<16x32xf32>
    %289 = vector.extract_strided_slice %167 {offsets = [5, 0], sizes = [1, 32], strides = [1, 1]} : vector<8x128xf32> to vector<1x32xf32>
    %290 = vector.broadcast %289 : vector<1x32xf32> to vector<16x32xf32>
    %291 = arith.addf %288, %290 : vector<16x32xf32>
    %292 = arith.addf %267, %291 : vector<16x32xf32>
    %293 = vector.extract_strided_slice %167 {offsets = [6, 0], sizes = [1, 32], strides = [1, 1]} : vector<8x128xf32> to vector<1x32xf32>
    %294 = vector.extract_strided_slice %167 {offsets = [7, 0], sizes = [1, 32], strides = [1, 1]} : vector<8x128xf32> to vector<1x32xf32>
    %cst_88 = arith.constant dense<0.000000e+00> : vector<16xf32>
    %295 = vector.multi_reduction <add>, %292, %cst_88 [1] : vector<16x32xf32> to vector<16xf32>
    %296 = vector.shape_cast %295 : vector<16xf32> to vector<16x1xf32>
    %cst_89 = arith.constant 3.200000e+01 : f32
    %297 = vector.broadcast %cst_89 : f32 to vector<16x1xf32>
    %298 = arith.divf %296, %297 : vector<16x1xf32>
    %299 = arith.mulf %292, %292 : vector<16x32xf32>
    %cst_90 = arith.constant dense<0.000000e+00> : vector<16xf32>
    %300 = vector.multi_reduction <add>, %299, %cst_90 [1] : vector<16x32xf32> to vector<16xf32>
    %301 = vector.shape_cast %300 : vector<16xf32> to vector<16x1xf32>
    %cst_91 = arith.constant 3.200000e+01 : f32
    %302 = vector.broadcast %cst_91 : f32 to vector<16x1xf32>
    %303 = arith.divf %301, %302 : vector<16x1xf32>
    %304 = arith.mulf %298, %298 : vector<16x1xf32>
    %305 = arith.subf %303, %304 : vector<16x1xf32>
    %cst_92 = arith.constant 0.000000e+00 : f32
    %306 = vector.broadcast %cst_92 : f32 to vector<16x1xf32>
    %307 = arith.maximumf %305, %306 : vector<16x1xf32>
    %308 = vector.broadcast %298 : vector<16x1xf32> to vector<16x32xf32>
    %309 = arith.subf %292, %308 : vector<16x32xf32>
    %cst_93 = arith.constant 9.99999974E-6 : f32
    %310 = vector.broadcast %cst_93 : f32 to vector<16x1xf32>
    %311 = arith.addf %307, %310 : vector<16x1xf32>
    %312 = math.rsqrt %311 : vector<16x1xf32>
    %313 = vector.broadcast %312 : vector<16x1xf32> to vector<16x32xf32>
    %314 = arith.mulf %309, %313 : vector<16x32xf32>
    %315 = vector.broadcast %293 : vector<1x32xf32> to vector<16x32xf32>
    %316 = arith.mulf %314, %315 : vector<16x32xf32>
    %317 = vector.broadcast %294 : vector<1x32xf32> to vector<16x32xf32>
    %318 = arith.addf %316, %317 : vector<16x32xf32>
    %c0_94 = arith.constant 0 : index
    %c0_95 = arith.constant 0 : index
    %319 = vector.load %arg6[%c0_94, %c0_95] : memref<40x128xf32, #tpu.memory_space<vmem>>, vector<32x128xf32>
    %cst_96 = arith.constant dense<0.000000e+00> : vector<16x128xf32>
    %320 = tpu.matmul %318, %319, %cst_96 {dimension_numbers = #tpu.dot_dimension_numbers<[1], [0], [0], [1], [0, 0, 1, 1], [], []>} : vector<16x32xf32>, vector<32x128xf32>, vector<16x128xf32> -> vector<16x128xf32>
    %c32 = arith.constant 32 : index
    %c0_97 = arith.constant 0 : index
    %321 = vector.load %arg6[%c32, %c0_97] : memref<40x128xf32, #tpu.memory_space<vmem>>, vector<1x128xf32>
    %322 = vector.broadcast %321 : vector<1x128xf32> to vector<16x128xf32>
    %323 = arith.addf %320, %322 : vector<16x128xf32>
    %c0_98 = arith.constant 0 : index
    %c0_99 = arith.constant 0 : index
    %324 = vector.load %arg7[%c0_98, %c0_99] : memref<16x128xf32, #tpu.memory_space<vmem>>, vector<16x128xf32>
    tpu.vector_store %arg7[%c0_98, %c0_99], %323 {strides = array<i32>} : memref<16x128xf32, #tpu.memory_space<vmem>>, vector<16x128xf32>,
    return
  }
}

</mosaic_0001>

<bundles_post_ra>
// kernel: tpu_custom_call.1
= control target key start
LH: loop header
LB: loop body
LE: loop exit
PB: predicated region body
PF: predicated region fallthrough
CT: control target
= control target key end

     0   :  { %12 = vsyncpa [#allocation3], 0  ;;  %s2677_s0 = inlined_call_operand.vmem [shape: f32[16,64], index: 0, kind: input, shape index: {}]   ;;  %s2678_s1 = inlined_call_operand.hbm [shape: f32[8,32], index: 1, kind: input, shape index: {}]   ;;  %s2679_s2 = inlined_call_operand.vmem [shape: f32[64,32], index: 2, kind: input, shape index: {}]   ;;  %s2680_s3 = inlined_call_operand.vmem [shape: f32[2,32,384], index: 3, kind: input, shape index: {}]   ;;  %s2681_s4 = inlined_call_operand.vmem [shape: f32[2,64,32], index: 4, kind: input, shape index: {}]   ;;  %s2682_s5 = inlined_call_operand.vmem [shape: f32[2,8,128], index: 5, kind: input, shape index: {}]   ;;  %s2683_s6 = inlined_call_operand.hbm [shape: f32[40,128], index: 6, kind: input, shape index: {}]   ;;  %s2684_s7 = inlined_call_operand.hbm [shape: f32[16,128], index: 7, kind: output, shape index: {}]  }
   0x1   :  { %13 = vsyncpa [#allocation6], 0 }
   0x2   :  { %14 = vsyncpa [#allocation4], 0  ;;  %s22_s26 = sshll.u32 %s2678_s1, 4  ;;  %s2129_s27 = smov [#allocation2]   ;;  %s23_s26 = int_to_ptr.hbm [resolvable:$true] %s22_s26 }
   0x3   :  { %s24_s28 = sshll.u32 %s2129_s27, 4  ;;  %s40_s8 = sshll.u32 %s2683_s6, 4  ;;  %s25_s28 = int_to_ptr.vmem [resolvable:$true] %s24_s28  ;;  %s41_s8 = int_to_ptr.hbm [resolvable:$true] %s40_s8 }
   0x4   :  { %27 = dma.hbm_to_vmem [thread:$0]  %s23_s26, 128, %s25_s28, [#allocation3]  }
   0x5   :  { %s2130_s9 = smov [#allocation5]   ;;  %s2131_s11 = smov 128  }
   0x6   :  { %s42_s10 = sshll.u32 %s2130_s9, 4  ;;  %s2132_s12 = smov 8   ;;  %s43_s10 = int_to_ptr.vmem [resolvable:$true] %s42_s10 }
   0x7   :  { %48 = dma.hbm_to_vmem [thread:$0]  %s41_s8, 640, %s43_s10, [#allocation6], %s2131_s11, %s2131_s11, %s2132_s12  }
   0x8   :  { %2123 = dma.done.wait [#allocation3], 128  }
   0x9   :  { %2124 = vsyncadd [#allocation3], 4294967168 }
   0xa   :  { %2125 = dma.done.wait [#allocation6], 640  }
   0xb   :  { %2126 = vsyncadd [#allocation6], 4294966656  ;;  %v66_v0 = vld [vmem:[%s2679_s2 + $0x38] sm:$0xff]  ;;  %v65_v1 = vld [vmem:[%s2679_s2 + $0x30] sm:$0xff]  ;;  %vm67_vm0 = vcmask 523264   ;;  %vm114_vm1 = vcmask 261120  }
   0xc   :  { %82 = vmatpush.msra.mxu0 %v66_v0  ;;  %v64_v2 = vld [vmem:[%s2679_s2 + $0x28] sm:$0xff]  ;;  %v106_v4 = vld [vmem:[%s2680_s3 + $0x30] sm:$0xff]  ;;  %v63_v5 = vld [vmem:[%s2679_s2 + $0x20] sm:$0xff]  ;;  %s2133_s16 = smov 88   ;;  %s2134_s17 = smov 96   ;;  %vm147_vm2 = vcmask 64512  }
   0xd   :  { %v109_v3 = vld [vmem:[%s2680_s3 + $0x48] sm:$0xff]  ;;  %v62_v6 = vld [vmem:[%s2679_s2 + $0x18] sm:$0xff]  ;;  %v61_v7 = vld [vmem:[%s2679_s2 + $0x10] sm:$0xff]  ;;  %s2135_s18 = smov 112   ;;  %s2136_s19 = smov 64   ;;  %vm689_vm3 = vcmask 130048  }
   0xe   :  { %83 = vmatpush.msra.mxu0 %v65_v1  ;;  %133 = vmatpush.msra.mxu1 %v109_v3  ;;  %v60_v8 = vld [vmem:[%s2679_s2 + $0x8] sm:$0xff]  ;;  %v59_v9 = vld [vmem:[%s2679_s2] sm:$0xff]  ;;  %v103_v12 = vld [vmem:[%s2680_s3 + $0x18] sm:$0xff]  ;;  %s2137_s20 = smov 120   ;;  %s2138_s21 = smov 80   ;;  %vm692_vm4 = vcmask 195584  }
   0xf   :  { %v57_v10 = vld [vmem:[%s2677_s0] sm:$0xff]  ;;  %v58_v11 = vld [vmem:[%s2677_s0 + $0x8] sm:$0xff]  ;;  %s2139_s22 = smov 72   ;;  %s2140_s23 = smov 104  }
  0x10   :  { %84 = vmatpush.msra.mxu0 %v64_v2  ;;  %134 = vmatpush.msra.mxu1 %v106_v4  ;;  %v100_v13 = vld [vmem:[%s2680_s3] sm:$0xff]  ;;  %s2141_s24 = smov 56   ;;  %s2142_s25 = smov 48  }
  0x11   :  { %v97_v14 = vld [vmem:[#allocation2] sm:$0xff]  ;;  %s2143_s26 = smov 40   ;;  %s2144_s27 = smov 16  }
  0x12   :  { %85 = vmatpush.msra.mxu0 %v63_v5  ;;  %135 = vmatpush.msra.mxu1 %v103_v12  ;;  %v2252_v20 = vld [vmem:[%s2682_s5] sm:$0xff]  ;;  %s2145_s28 = smov 24  }
  0x13   :  { %v113_v21 = vperm.slane %v2252_v20, 0 }
  0x14   :  { %86 = vmatpush.msra.mxu0 %v62_v6  ;;  %136 = vmatpush.msra.mxu1 %v100_v13 }
  0x16   :  { %87 = vmatpush.msra.mxu0 %v61_v7 }
  0x18   :  { %88 = vmatpush.msra.mxu0 %v60_v8 }
  0x1a   :  { %89 = vmatpush.msra.mxu0 %v59_v9 }
  0x1b   :  { %1817 = vmatmul.msk.f32.vlgmr.msra.gmra.mxu0 %vm67_vm0, %v57_v10 }
  0x23   :  { %1818 = vmatmul.msk.f32.gmra.mxu0 %vm67_vm0, %v58_v11 }
  0x98   :  { %v91_v15 = vpop.f32.mrf.mxu0 }
  0x99   :  { %v2241_v16 = vadd.f32 %v97_v14, %v91_v15 }
  0x9b   :  { %1819 = vmatmul.msk.f32.vlgmr.msra.gmra.mxu1 %vm114_vm1, %v2241_v16 }
  0xa0   :  { %v94_v17 = vpop.f32.mrf.mxu0 }
  0xa1   :  { %v2245_v18 = vadd.f32 %v97_v14, %v94_v17 }
  0xa3   :  { %1820 = vmatmul.msk.f32.gmra.mxu1 %vm114_vm1, %v2245_v18 }
 0x118   :  { %v138_v19 = vpop.f32.mrf.mxu1 }
 0x119   :  { %v139_v24 = vadd.f32 %v138_v19, %v113_v21 }
 0x120   :  { %v141_v22 = vpop.f32.mrf.mxu1 }
 0x121   :  { %v2255_v23 = vadd.f32 %v141_v22, %v113_v21 }
 0x123   :  { %303 = vrot.lane.b32.xlu2 %v2255_v23, %s2133_s16  ;;  %173 = vrot.lane.b32.xlu0 %v2255_v23, %s2134_s17  ;;  %v2264_v25 = vpack.i.bf16 %v2255_v23, %v139_v24 }
 0x12b   :  { %403 = vrot.lane.b32.xlu2 %v139_v24, %s2135_s18  ;;  %145 = vrot.lane.b32.xlu0 %v139_v24, %s2134_s17 }
 0x133   :  { %1926 = vrot.lane.b32.xlu0 %v2264_v25, %s2136_s19 }
 0x13b   :  { %273 = vrot.lane.b32.xlu0 %v139_v24, %s2137_s20 }
 0x143   :  { %301 = vrot.lane.b32.xlu0 %v2255_v23, %s2137_s20 }
 0x14b   :  { %405 = vrot.lane.b32.xlu0 %v139_v24, %s2138_s21 }
 0x153   :  { %535 = vrot.lane.b32.xlu0 %v139_v24, %s2139_s22 }
 0x15b   :  { %563 = vrot.lane.b32.xlu0 %v2255_v23, %s2139_s22 }
 0x17d   :  { %v304_v31 = vpop.permute.xlu2 %303 }
 0x185   :  { %v404_v53 = vpop.permute.xlu2 %403 }
 0x195   :  { %v174_v26 = vpop.permute.xlu0 %173 }
 0x196   :  { %1823 = vmatpush.xpose.msk.msra.mxu3 %vm147_vm2, %v174_v26 }
 0x199   :  { %1824 = vmatmul.msk.f32.vlgmr.msra.gmra.mxu3 %vm147_vm2, %v2255_v23 }
 0x19d   :  { %v146_v27 = vpop.permute.xlu0 %145 }
 0x19e   :  { %1821 = vmatpush.xpose.msk.msrb.mxu0 %vm147_vm2, %v146_v27 }
 0x1a1   :  { %1822 = vmatmul.msk.f32.vlgmr.msrb.gmra.mxu0 %vm147_vm2, %v139_v24 }
 0x1a5   :  { %v1927_v28 = vpop.permute.xlu0 %1926 }
 0x1a6   :  { %v1928_v29 = vunpack.i.l.bf16 %v1927_v28  ;;  %v1929_v30 = vunpack.i.h.bf16 %v1927_v28 }
 0x1a8   :  { %242 = vmatpush.msra.mxu2 %v1928_v29  ;;  %268 = vmatpush.msrb.mxu3 %v1929_v30 }
 0x1aa   :  { %1829 = vmatpush.xpose.msk.msra.mxu3 %vm147_vm2, %v304_v31 }
 0x1ad   :  { %v274_v37 = vpop.permute.xlu0 %273 }
 0x1b5   :  { %v302_v43 = vpop.permute.xlu0 %301 }
 0x1bd   :  { %v406_v48 = vpop.permute.xlu0 %405 }
 0x1c5   :  { %v536_v49 = vpop.permute.xlu0 %535 }
 0x1cd   :  { %v564_v52 = vpop.permute.xlu0 %563 }
 0x21c   :  { %v196_v34 = vpop.f32.mrf.mxu3 }
 0x21d   :  { %v202_v35 = vsel %vm147_vm2, %v196_v34, -inf }
 0x21e   :  { %v169_v32 = vpop.f32.mrf.mxu0 }
 0x21f   :  { %v199_v33 = vsel %vm147_vm2, %v169_v32, -inf }
 0x220   :  { %200 = vmax.xlane.f32.xlu1 %v199_v33 }
 0x228   :  { %203 = vmax.xlane.f32.xlu1 %v202_v35 }
 0x241   :  { %275 = vrot.lane.b32.xlu1 %v139_v24, %s2133_s16 }
 0x249   :  { %433 = vrot.lane.b32.xlu1 %v2255_v23, %s2138_s21 }
 0x251   :  { %533 = vrot.lane.b32.xlu1 %v139_v24, %s2140_s23 }
 0x293   :  { %v201_v36 = vpop.xlane.xlu1 %200 }
 0x294   :  { %v205_v38 = vsub.f32 %v169_v32, %v201_v36 }
 0x296   :  { %v207_v39 = vmul.f32 1.442695, %v205_v38 }
 0x298   :  { %1961 = vpow2.f32 %v207_v39 }
 0x29b   :  { %v204_v40 = vpop.xlane.xlu1 %203 }
 0x29c   :  { %v206_v41 = vsub.f32 %v196_v34, %v204_v40 }
 0x29e   :  { %v1962_v42 = vpop.eup %1961  ;;  %v209_v44 = vmul.f32 1.442695, %v206_v41 }
 0x29f   :  { %v211_v45 = vsel %vm147_vm2, %v1962_v42, 0.0 }
 0x2a0   :  { %1963 = vpow2.f32 %v209_v44  ;;  %212 = vadd.xlane.f32.xlu2 %v211_v45 }
 0x2a6   :  { %v1964_v46 = vpop.eup %1963 }
 0x2a7   :  { %v214_v47 = vsel %vm147_vm2, %v1964_v46, 0.0 }
 0x2a8   :  { %215 = vadd.xlane.f32.xlu2 %v214_v47 }
 0x2b3   :  { %v276_v50 = vpop.permute.xlu1 %275 }
 0x2b4   :  { %1827 = vmatpush.xpose.msk.msrb.mxu2 %vm147_vm2, %v276_v50 }
 0x2bb   :  { %v434_v51 = vpop.permute.xlu1 %433 }
 0x2bc   :  { %1835 = vmatpush.xpose.msk.msra.mxu0 %vm147_vm2, %v434_v51 }
 0x2c0   :  { %1841 = vmatpush.xpose.msk.msrb.mxu0 %vm147_vm2, %v564_v52  ;;  %431 = vrot.lane.b32.xlu2 %v2255_v23, %s2135_s18 }
 0x2c3   :  { %v534_v62 = vpop.permute.xlu1 %533 }
 0x2c8   :  { %561 = vrot.lane.b32.xlu2 %v2255_v23, %s2140_s23 }
 0x313   :  { %v213_v54 = vpop.xlane.xlu2 %212 }
 0x314   :  { %1965 = vrcp.f32 %v213_v54 }
 0x31a   :  { %v1966_v55 = vpop.eup %1965 }
 0x31b   :  { %v216_v56 = vpop.xlane.xlu2 %215  ;;  %v219_v57 = vmul.f32 %v1966_v55, %v1962_v42 }
 0x31c   :  { %1967 = vrcp.f32 %v216_v56 }
 0x31d   :  { %1825 = vmatmul.msk.f32.vlgmr.msra.gmra.mxu2 %vm147_vm2, %v219_v57 }
 0x322   :  { %v1968_v58 = vpop.eup %1967 }
 0x323   :  { %v432_v59 = vpop.permute.xlu2 %431  ;;  %v220_v60 = vmul.f32 %v1968_v58, %v1964_v46 }
 0x324   :  { %1836 = vmatmul.msk.f32.vlgmr.msra.gmra.mxu0 %vm147_vm2, %v432_v59 }
 0x325   :  { %1826 = vmatmul.msk.f32.vlgmr.msrb.gmra.mxu3 %vm147_vm2, %v220_v60  ;;  %1828 = vmatmul.msk.f32.vlgmr.msrb.gmra.mxu2 %vm147_vm2, %v274_v37 }
 0x326   :  { %1833 = vmatpush.xpose.msk.msrb.mxu3 %vm147_vm2, %v406_v48 }
 0x32b   :  { %v562_v61 = vpop.permute.xlu2 %561 }
 0x32c   :  { %1842 = vmatmul.msk.f32.vlgmr.msrb.gmra.mxu0 %vm147_vm2, %v562_v61 }
 0x32d   :  { %1830 = vmatmul.msk.f32.vlgmr.msra.gmra.mxu3 %vm147_vm2, %v302_v43 }
 0x32e   :  { %1839 = vmatpush.xpose.msk.msra.mxu3 %vm147_vm2, %v536_v49 }
 0x335   :  { %1834 = vmatmul.msk.f32.vlgmr.msrb.gmra.mxu3 %vm147_vm2, %v404_v53 }
 0x33d   :  { %1840 = vmatmul.msk.f32.vlgmr.msra.gmra.mxu3 %vm147_vm2, %v534_v62 }
 0x3a0   :  { %v2306_v63 = vpop.f32.mrf.mxu2 }
 0x3a1   :  { %v456_v3 = vpop.f32.mrf.mxu0 }
 0x3a2   :  { %v462_v6 = vsel %vm147_vm2, %v456_v3, -inf }
 0x3a8   :  { %v2308_v0 = vpop.f32.mrf.mxu3  ;;  %v298_v1 = vpop.f32.mrf.mxu2 }
 0x3a9   :  { %v329_v2 = vsel %vm147_vm2, %v298_v1, -inf  ;;  %v586_v7 = vpop.f32.mrf.mxu0 }
 0x3aa   :  { %330 = vmax.xlane.f32.xlu1 %v329_v2  ;;  %v592_v10 = vsel %vm147_vm2, %v586_v7, -inf }
 0x3b0   :  { %v326_v4 = vpop.f32.mrf.mxu3 }
 0x3b1   :  { %v332_v5 = vsel %vm147_vm2, %v326_v4, -inf }
 0x3b2   :  { %333 = vmax.xlane.f32.xlu0 %v332_v5  ;;  %463 = vmax.xlane.f32.xlu1 %v462_v6 }
 0x3b8   :  { %v428_v8 = vpop.f32.mrf.mxu3 }
 0x3b9   :  { %v459_v9 = vsel %vm147_vm2, %v428_v8, -inf }
 0x3ba   :  { %460 = vmax.xlane.f32.xlu2 %v459_v9  ;;  %593 = vmax.xlane.f32.xlu0 %v592_v10 }
 0x3c0   :  { %v558_v11 = vpop.f32.mrf.mxu3 }
 0x3c1   :  { %v589_v12 = vsel %vm147_vm2, %v558_v11, -inf }
 0x3c2   :  { %590 = vmax.xlane.f32.xlu2 %v589_v12 }
 0x41d   :  { %v331_v13 = vpop.xlane.xlu1 %330 }
 0x41e   :  { %v335_v14 = vsub.f32 %v298_v1, %v331_v13 }
 0x420   :  { %v337_v15 = vmul.f32 1.442695, %v335_v14 }
 0x422   :  { %1969 = vpow2.f32 %v337_v15 }
 0x425   :  { %v334_v17 = vpop.xlane.xlu0 %333  ;;  %v464_v19 = vpop.xlane.xlu1 %463 }
 0x426   :  { %v466_v21 = vsub.f32 %v456_v3, %v464_v19  ;;  %v336_v24 = vsub.f32 %v326_v4, %v334_v17  ;;  %v110_v19 = vld [vmem:[%s2680_s3 + $0x50] sm:$0xff] }
 0x427   :  { %714 = vmatpush.msrb.mxu3 %v110_v19 }
 0x428   :  { %v1970_v22 = vpop.eup %1969  ;;  %v469_v23 = vmul.f32 1.442695, %v466_v21  ;;  %v339_v27 = vmul.f32 1.442695, %v336_v24  ;;  %v107_v21 = vld [vmem:[%s2680_s3 + $0x38] sm:$0xff] }
 0x429   :  { %v341_v26 = vsel %vm147_vm2, %v1970_v22, 0.0  ;;  %715 = vmatpush.msrb.mxu3 %v107_v21 }
 0x42a   :  { %342 = vadd.xlane.f32.xlu1 %v341_v26  ;;  %1971 = vpow2.f32 %v469_v23  ;;  %v101_v23 = vld [vmem:[%s2680_s3 + $0x8] sm:$0xff] }
 0x42b   :  { %1973 = vpow2.f32 %v339_v27 }
 0x42d   :  { %v461_v28 = vpop.xlane.xlu2 %460  ;;  %v594_v29 = vpop.xlane.xlu0 %593 }
 0x42e   :  { %v596_v30 = vsub.f32 %v586_v7, %v594_v29  ;;  %v465_v33 = vsub.f32 %v428_v8, %v461_v28 }
 0x430   :  { %v599_v31 = vmul.f32 1.442695, %v596_v30  ;;  %v1972_v32 = vpop.eup %1971  ;;  %v467_v35 = vmul.f32 1.442695, %v465_v33 }
 0x431   :  { %v474_v34 = vsel %vm147_vm2, %v1972_v32, 0.0  ;;  %v1974_v37 = vpop.eup %1973 }
 0x432   :  { %1975 = vpow2.f32 %v599_v31  ;;  %475 = vadd.xlane.f32.xlu2 %v474_v34  ;;  %v344_v41 = vsel %vm147_vm2, %v1974_v37, 0.0 }
 0x433   :  { %1977 = vpow2.f32 %v467_v35 }
 0x435   :  { %v591_v36 = vpop.xlane.xlu2 %590 }
 0x436   :  { %v595_v39 = vsub.f32 %v558_v11, %v591_v36 }
 0x438   :  { %v1976_v38 = vpop.eup %1975  ;;  %v597_v42 = vmul.f32 1.442695, %v595_v39 }
 0x439   :  { %v604_v40 = vsel %vm147_vm2, %v1976_v38, 0.0  ;;  %v1978_v43 = vpop.eup %1977 }
 0x43a   :  { %605 = vadd.xlane.f32.xlu0 %v604_v40  ;;  %345 = vadd.xlane.f32.xlu2 %v344_v41  ;;  %1979 = vpow2.f32 %v597_v42  ;;  %v471_v44 = vsel %vm147_vm2, %v1978_v43, 0.0 }
 0x440   :  { %v1980_v45 = vpop.eup %1979 }
 0x441   :  { %v601_v46 = vsel %vm147_vm2, %v1980_v45, 0.0 }
 0x442   :  { %472 = vadd.xlane.f32.xlu0 %v471_v44 }
 0x443   :  { %1931 = vrot.lane.b32.xlu1 %v2264_v25, %s2141_s24 }
 0x44a   :  { %602 = vadd.xlane.f32.xlu0 %v601_v46 }
 0x452   :  { %1936 = vrot.lane.b32.xlu2 %v2264_v25, %s2142_s25 }
 0x45e   :  { %1941 = vrot.lane.b32.xlu0 %v2264_v25, %s2143_s26 }
 0x49d   :  { %v343_v48 = vpop.xlane.xlu1 %342 }
 0x49e   :  { %1981 = vrcp.f32 %v343_v48 }
 0x4a4   :  { %v1982_v51 = vpop.eup %1981 }
 0x4a5   :  { %v476_v47 = vpop.xlane.xlu2 %475  ;;  %v349_v58 = vmul.f32 %v1982_v51, %v1970_v22  ;;  %v104_v22 = vld [vmem:[%s2680_s3 + $0x20] sm:$0xff] }
 0x4a6   :  { %716 = vmatpush.msrb.mxu3 %v104_v22  ;;  %v784_v22 = vperm.slane %v2252_v20, 2 }
 0x4a8   :  { %717 = vmatpush.msrb.mxu3 %v101_v23 }
 0x4ad   :  { %v606_v49 = vpop.xlane.xlu0 %605  ;;  %v346_v50 = vpop.xlane.xlu2 %345 }
 0x4ae   :  { %1983 = vrcp.f32 %v346_v50 }
 0x4af   :  { %1985 = vrcp.f32 %v476_v47  ;;  %v2146_v47 = vmov 32.0  }
 0x4b4   :  { %v1984_v53 = vpop.eup %1983 }
 0x4b5   :  { %v1932_v52 = vpop.permute.xlu1 %1931  ;;  %v473_v54 = vpop.xlane.xlu0 %472  ;;  %v350_v59 = vmul.f32 %v1984_v53, %v1974_v37 }
 0x4b6   :  { %v1937_v55 = vpop.permute.xlu2 %1936  ;;  %v1934_v56 = vunpack.i.h.bf16 %v1932_v52  ;;  %v1933_v57 = vunpack.i.l.bf16 %v1932_v52  ;;  %1987 = vrcp.f32 %v473_v54  ;;  %v1986_v25 = vpop.eup %1985  ;;  %v108_v54 = vld [vmem:[%s2680_s3 + $0x40] sm:$0xff] }
 0x4b7   :  { %v1939_v60 = vunpack.i.h.bf16 %v1937_v55  ;;  %v1938_v61 = vunpack.i.l.bf16 %v1937_v55  ;;  %v480_v1 = vmul.f32 %v1986_v25, %v1972_v32  ;;  %1989 = vrcp.f32 %v606_v49 }
 0x4b8   :  { %372 = vmatpush.msrb.mxu1 %v1933_v57  ;;  %398 = vmatpush.msra.mxu2 %v1934_v56  ;;  %v105_v57 = vld [vmem:[%s2680_s3 + $0x28] sm:$0xff] }
 0x4b9   :  { %1831 = vmatmul.msk.f32.vlgmr.msrb.gmra.mxu1 %vm147_vm2, %v349_v58  ;;  %1832 = vmatmul.msk.f32.vlgmr.msra.gmra.mxu2 %vm147_vm2, %v350_v59 }
 0x4ba   :  { %502 = vmatpush.msra.mxu1 %v1938_v61  ;;  %528 = vmatpush.msrb.mxu2 %v1939_v60  ;;  %v102_v61 = vld [vmem:[%s2680_s3 + $0x10] sm:$0xff] }
 0x4bc   :  { %v1988_v62 = vpop.eup %1987 }
 0x4bd   :  { %v479_v2 = vmul.f32 %v1988_v62, %v1978_v43  ;;  %v603_v3 = vpop.xlane.xlu0 %602  ;;  %v1990_v4 = vpop.eup %1989 }
 0x4be   :  { %1991 = vrcp.f32 %v603_v3  ;;  %v610_v9 = vmul.f32 %v1990_v4, %v1976_v38 }
 0x4bf   :  { %1993 = vrcp.f32 %v2146_v47 }
 0x4c1   :  { %1837 = vmatmul.msk.f32.vlgmr.msra.gmra.mxu1 %vm147_vm2, %v479_v2  ;;  %1838 = vmatmul.msk.f32.vlgmr.msrb.gmra.mxu2 %vm147_vm2, %v480_v1 }
 0x4c4   :  { %v1992_v5 = vpop.eup %1991 }
 0x4c5   :  { %v609_v10 = vmul.f32 %v1992_v5, %v1980_v45  ;;  %v1994_v48 = vpop.eup %1993 }
 0x4c6   :  { %v734_v49 = vmul.f32 32.0, %v1994_v48  ;;  %vm738_vm5 = vweird.f32 %v1994_v48 }
 0x4c8   :  { %v735_v50 = vsub.f32 1.0, %v734_v49 }
 0x4ca   :  { %v736_v51 = vmul.f32 %v1994_v48, %v735_v50 }
 0x4cc   :  { %v737_v52 = vadd.f32 %v1994_v48, %v736_v51 }
 0x4ce   :  { %v2382_v53 = vsel %vm738_vm5, %v1994_v48, %v737_v52 }
 0x4d0   :  { %v1942_v6 = vpop.permute.xlu0 %1941 }
 0x4d1   :  { %v1944_v7 = vunpack.i.h.bf16 %v1942_v6  ;;  %v1943_v8 = vunpack.i.l.bf16 %v1942_v6 }
 0x4d3   :  { %632 = vmatpush.msrb.mxu1 %v1943_v8  ;;  %658 = vmatpush.msra.mxu2 %v1944_v7 }
 0x4d4   :  { %1843 = vmatmul.msk.f32.vlgmr.msrb.gmra.mxu1 %vm147_vm2, %v609_v10  ;;  %1844 = vmatmul.msk.f32.vlgmr.msra.gmra.mxu2 %vm147_vm2, %v610_v9 }
 0x536   :  { %v374_v11 = vpop.f32.mrf.mxu1 }
 0x537   :  { %665 = vrot.lane.b32.xlu1 %v374_v11, %s2132_s12 }
 0x53c   :  { %v400_v12 = vpop.f32.mrf.mxu2 }
 0x53e   :  { %v504_v13 = vpop.f32.mrf.mxu1 }
 0x53f   :  { %673 = vrot.lane.b32.xlu1 %v504_v13, %s2144_s27 }
 0x544   :  { %v530_v14 = vpop.f32.mrf.mxu2 }
 0x545   :  { %675 = vrot.lane.b32.xlu0 %v530_v14, %s2144_s27 }
 0x547   :  { %667 = vrot.lane.b32.xlu1 %v400_v12, %s2132_s12 }
 0x551   :  { %v634_v15 = vpop.f32.mrf.mxu1 }
 0x552   :  { %681 = vrot.lane.b32.xlu2 %v634_v15, %s2145_s28 }
 0x557   :  { %v660_v17 = vpop.f32.mrf.mxu2 }
 0x55a   :  { %683 = vrot.lane.b32.xlu2 %v660_v17, %s2145_s28 }
 0x5a9   :  { %v666_v24 = vpop.permute.xlu1 %665 }
 0x5aa   :  { %v687_v26 = vsel %vm147_vm2, %v2306_v63, %v666_v24  ;;  %v695_v63 = vperm.slane %v2252_v20, 1 }
 0x5ac   :  { %v682_v27 = vpop.permute.xlu2 %681 }
 0x5b1   :  { %v674_v28 = vpop.permute.xlu1 %673 }
 0x5b2   :  { %v690_v29 = vsel %vm689_vm3, %v687_v26, %v674_v28 }
 0x5b3   :  { %v693_v30 = vsel %vm692_vm4, %v690_v29, %v682_v27  ;;  %v787_v27 = vperm.slane %v2252_v20, 3 }
 0x5b4   :  { %1845 = vmatmul.msk.f32.vlgmr.msrb.gmra.mxu3 %vm114_vm1, %v693_v30  ;;  %v684_v34 = vpop.permute.xlu2 %683 }
 0x5b7   :  { %v676_v32 = vpop.permute.xlu0 %675 }
 0x5b9   :  { %v668_v31 = vpop.permute.xlu1 %667 }
 0x5ba   :  { %v688_v33 = vsel %vm147_vm2, %v2308_v0, %v668_v31 }
 0x5bb   :  { %v691_v35 = vsel %vm689_vm3, %v688_v33, %v676_v32 }
 0x5bc   :  { %v694_v36 = vsel %vm692_vm4, %v691_v35, %v684_v34 }
 0x5bd   :  { %1846 = vmatmul.msk.f32.gmra.mxu3 %vm114_vm1, %v694_v36 }
 0x637   :  { %v719_v37 = vpop.f32.mrf.mxu3 }
 0x638   :  { %v720_v38 = vadd.f32 %v719_v37, %v695_v63  ;;  %v845_v37 = vld [vmem:[%s2681_s4 + $0x38] sm:$0xff] }
 0x639   :  { %861 = vmatpush.msra.mxu1 %v845_v37 }
 0x63a   :  { %v2364_v39 = vadd.f32 %v720_v38, %v2241_v16  ;;  %v844_v38 = vld [vmem:[%s2681_s4 + $0x30] sm:$0xff] }
 0x63b   :  { %862 = vmatpush.msra.mxu1 %v844_v38 }
 0x63c   :  { %v727_v40 = vsel %vm114_vm1, %v2364_v39, 0.0  ;;  %v742_v0 = vmul.f32 %v2364_v39, %v2364_v39 }
 0x63d   :  { %728 = vadd.xlane.f32.xlu1 %v727_v40  ;;  %v842_v40 = vld [vmem:[%s2681_s4 + $0x20] sm:$0xff] }
 0x63e   :  { %v744_v41 = vsel %vm114_vm1, %v742_v0, 0.0  ;;  %v841_v0 = vld [vmem:[%s2681_s4 + $0x18] sm:$0xff] }
 0x63f   :  { %745 = vadd.xlane.f32.xlu0 %v744_v41  ;;  %v840_v41 = vld [vmem:[%s2681_s4 + $0x10] sm:$0xff] }
 0x640   :  { %v722_v42 = vpop.f32.mrf.mxu3 }
 0x641   :  { %v723_v43 = vadd.f32 %v722_v42, %v695_v63  ;;  %v839_v42 = vld [vmem:[%s2681_s4 + $0x8] sm:$0xff] }
 0x643   :  { %v2372_v44 = vadd.f32 %v723_v43, %v2245_v18  ;;  %v111_v18 = vld [vmem:[%s2680_s3 + $0x58] sm:$0xff]  ;;  %v838_v43 = vld [vmem:[%s2681_s4] sm:$0xff] }
 0x644   :  { %809 = vmatpush.msra.mxu0 %v111_v18 }
 0x645   :  { %v730_v45 = vsel %vm114_vm1, %v2372_v44, 0.0  ;;  %v743_v16 = vmul.f32 %v2372_v44, %v2372_v44 }
 0x646   :  { %731 = vadd.xlane.f32.xlu2 %v730_v45  ;;  %810 = vmatpush.msra.mxu0 %v108_v54 }
 0x647   :  { %v747_v46 = vsel %vm114_vm1, %v743_v16, 0.0 }
 0x648   :  { %748 = vadd.xlane.f32.xlu1 %v747_v46  ;;  %811 = vmatpush.msra.mxu0 %v105_v57 }
 0x64a   :  { %812 = vmatpush.msra.mxu0 %v102_v61 }
 0x6b0   :  { %v729_v55 = vpop.xlane.xlu1 %728 }
 0x6b1   :  { %v740_v56 = vmul.f32 %v2382_v53, %v729_v55 }
 0x6b2   :  { %v746_v58 = vpop.xlane.xlu0 %745 }
 0x6b3   :  { %v752_v59 = vmul.f32 %v740_v56, %v740_v56  ;;  %v750_v60 = vmul.f32 %v746_v58, %v2382_v53  ;;  %v758_v19 = vsub.f32 %v2364_v39, %v740_v56  ;;  %v843_v39 = vld [vmem:[%s2681_s4 + $0x28] sm:$0xff] }
 0x6b4   :  { %863 = vmatpush.msra.mxu1 %v843_v39 }
 0x6b5   :  { %v754_v25 = vsub.f32 %v750_v60, %v752_v59 }
 0x6b6   :  { %864 = vmatpush.msra.mxu1 %v842_v40 }
 0x6b7   :  { %v756_v62 = vmax.f32 %v754_v25, 0.0 }
 0x6b8   :  { %865 = vmatpush.msra.mxu1 %v841_v0 }
 0x6b9   :  { %v760_v1 = vadd.f32 1e-05, %v756_v62  ;;  %v732_v2 = vpop.xlane.xlu2 %731 }
 0x6ba   :  { %v741_v3 = vmul.f32 %v2382_v53, %v732_v2  ;;  %866 = vmatpush.msra.mxu1 %v840_v41 }
 0x6bb   :  { %1995 = vrsqrt.f32 %v760_v1  ;;  %v749_v4 = vpop.xlane.xlu1 %748  ;;  %vm768_vm7 = vweird.f32 %v760_v1 }
 0x6bc   :  { %v753_v5 = vmul.f32 %v741_v3, %v741_v3  ;;  %v751_v6 = vmul.f32 %v749_v4, %v2382_v53  ;;  %v759_v33 = vsub.f32 %v2372_v44, %v741_v3  ;;  %867 = vmatpush.msra.mxu1 %v839_v42  ;;  %v790_v44 = vperm.slane %v2252_v20, 4 }
 0x6bd   :  { %v846_v3 = vperm.slane %v2252_v20, 5 }
 0x6be   :  { %v755_v7 = vsub.f32 %v751_v6, %v753_v5  ;;  %868 = vmatpush.msra.mxu1 %v838_v43 }
 0x6c0   :  { %v757_v8 = vmax.f32 %v755_v7, 0.0 }
 0x6c1   :  { %v1996_v9 = vpop.eup %1995 }
 0x6c2   :  { %v763_v10 = vmul.f32 %v1996_v9, %v760_v1  ;;  %v761_v11 = vadd.f32 1e-05, %v757_v8  ;;  %vm769_vm6 = vweird.f32 %v1996_v9 }
 0x6c3   :  { %vm770_vm8 = vmor %vm768_vm7, %vm769_vm6 }
 0x6c4   :  { %v764_v12 = vmul.f32 %v1996_v9, %v763_v10  ;;  %1997 = vrsqrt.f32 %v761_v11  ;;  %vm778_vm10 = vweird.f32 %v761_v11 }
 0x6c6   :  { %v765_v13 = vmul.f32 0.5, %v764_v12 }
 0x6c8   :  { %v766_v14 = vsub.f32 1.5, %v765_v13 }
 0x6ca   :  { %v1998_v15 = vpop.eup %1997  ;;  %v767_v17 = vmul.f32 %v1996_v9, %v766_v14 }
 0x6cb   :  { %v773_v21 = vmul.f32 %v1998_v15, %v761_v11  ;;  %vm779_vm9 = vweird.f32 %v1998_v15 }
 0x6cc   :  { %v771_v23 = vsel %vm770_vm8, %v1996_v9, %v767_v17  ;;  %vm780_vm11 = vmor %vm778_vm10, %vm779_vm9  ;;  %v1860_v17 = vld [vmem:[%s2680_s3 + $0xa8] sm:$0xff] }
 0x6cd   :  { %v782_v24 = vmul.f32 %v771_v23, %v758_v19  ;;  %v774_v26 = vmul.f32 %v1998_v15, %v773_v21  ;;  %968 = vmatpush.msrb.mxu2 %v1860_v17  ;;  %v1857_v19 = vld [vmem:[%s2680_s3 + $0x90] sm:$0xff]  ;;  %v1854_v23 = vld [vmem:[%s2680_s3 + $0x78] sm:$0xff] }
 0x6cf   :  { %v775_v28 = vmul.f32 0.5, %v774_v26  ;;  %v785_v29 = vmul.f32 %v784_v22, %v782_v24  ;;  %969 = vmatpush.msrb.mxu2 %v1857_v19 }
 0x6d1   :  { %v776_v30 = vsub.f32 1.5, %v775_v28  ;;  %v788_v31 = vadd.f32 %v787_v27, %v785_v29  ;;  %970 = vmatpush.msrb.mxu2 %v1854_v23  ;;  %v1851_v28 = vld [vmem:[%s2680_s3 + $0x60] sm:$0xff] }
 0x6d3   :  { %v777_v32 = vmul.f32 %v1998_v15, %v776_v30  ;;  %1847 = vmatmul.msk.f32.vlgmr.msra.gmra.mxu0 %vm114_vm1, %v788_v31  ;;  %971 = vmatpush.msrb.mxu2 %v1851_v28 }
 0x6d5   :  { %v781_v34 = vsel %vm780_vm11, %v1998_v15, %v777_v32 }
 0x6d6   :  { %v783_v35 = vmul.f32 %v781_v34, %v759_v33 }
 0x6d8   :  { %v786_v36 = vmul.f32 %v784_v22, %v783_v35 }
 0x6da   :  { %v789_v63 = vadd.f32 %v787_v27, %v786_v36 }
 0x6dc   :  { %1848 = vmatmul.msk.f32.gmra.mxu0 %vm114_vm1, %v789_v63 }
 0x750   :  { %v814_v45 = vpop.f32.mrf.mxu0 }
 0x751   :  { %v815_v16 = vadd.f32 %v814_v45, %v790_v44 }
 0x753   :  { %v822_v46 = vmul.f32 0.044715, %v815_v16  ;;  %v820_v58 = vmul.f32 0.5, %v815_v16 }
 0x755   :  { %v824_v47 = vmul.f32 %v822_v46, %v815_v16  ;;  %v928_v46 = vperm.slane %v2252_v20, 6 }
 0x757   :  { %v826_v48 = vmul.f32 %v824_v47, %v815_v16 }
 0x759   :  { %v828_v49 = vadd.f32 %v826_v48, %v815_v16  ;;  %v817_v50 = vpop.f32.mrf.mxu0 }
 0x75a   :  { %v818_v51 = vadd.f32 %v817_v50, %v790_v44  ;;  %v931_v50 = vperm.slane %v2252_v20, 7  ;;  %v2464_v20 = vld [vmem:[%s2682_s5 + $0x8] sm:$0xff] }
 0x75b   :  { %v830_v52 = vmul.f32 0.7978846, %v828_v49 }
 0x75c   :  { %v823_v18 = vmul.f32 0.044715, %v818_v51  ;;  %v821_v62 = vmul.f32 0.5, %v818_v51 }
 0x75d   :  { %1999 = vtanh.f32 %v830_v52 }
 0x75e   :  { %v825_v54 = vmul.f32 %v823_v18, %v818_v51 }
 0x760   :  { %v827_v55 = vmul.f32 %v825_v54, %v818_v51 }
 0x762   :  { %v829_v56 = vadd.f32 %v827_v55, %v818_v51 }
 0x763   :  { %v2000_v57 = vpop.eup %1999 }
 0x764   :  { %v834_v59 = vadd.f32 1.0, %v2000_v57  ;;  %v831_v60 = vmul.f32 0.7978846, %v829_v56 }
 0x766   :  { %v836_v61 = vmul.f32 %v834_v59, %v820_v58  ;;  %2001 = vtanh.f32 %v831_v60 }
 0x768   :  { %1849 = vmatmul.msk.f32.vlgmr.msra.gmra.mxu1 %vm67_vm0, %v836_v61  ;;  %v949_v61 = vperm.slane %v2464_v20, 0 }
 0x76c   :  { %v2002_v25 = vpop.eup %2001 }
 0x76d   :  { %v835_v1 = vadd.f32 1.0, %v2002_v25 }
 0x76f   :  { %v837_v2 = vmul.f32 %v835_v1, %v821_v62 }
 0x771   :  { %1850 = vmatmul.msk.f32.gmra.mxu1 %vm67_vm0, %v837_v2 }
 0x7e5   :  { %v870_v4 = vpop.f32.mrf.mxu1 }
 0x7e6   :  { %v871_v5 = vadd.f32 %v870_v4, %v846_v3 }
 0x7e8   :  { %v876_v6 = vadd.f32 %v871_v5, %v788_v31 }
 0x7ea   :  { %v878_v7 = vsel %vm114_vm1, %v876_v6, 0.0  ;;  %v886_v8 = vmul.f32 %v876_v6, %v876_v6 }
 0x7eb   :  { %879 = vadd.xlane.f32.xlu0 %v878_v7 }
 0x7ec   :  { %v888_v9 = vsel %vm114_vm1, %v886_v8, 0.0 }
 0x7ed   :  { %889 = vadd.xlane.f32.xlu2 %v888_v9 }
 0x7ee   :  { %v873_v10 = vpop.f32.mrf.mxu1 }
 0x7ef   :  { %v874_v11 = vadd.f32 %v873_v10, %v846_v3 }
 0x7f1   :  { %v877_v12 = vadd.f32 %v874_v11, %v789_v63 }
 0x7f3   :  { %v881_v13 = vsel %vm114_vm1, %v877_v12, 0.0  ;;  %v887_v14 = vmul.f32 %v877_v12, %v877_v12 }
 0x7f4   :  { %882 = vadd.xlane.f32.xlu1 %v881_v13 }
 0x7f5   :  { %v891_v15 = vsel %vm114_vm1, %v887_v14, 0.0 }
 0x7f6   :  { %892 = vadd.xlane.f32.xlu0 %v891_v15 }
 0x85e   :  { %v880_v21 = vpop.xlane.xlu0 %879 }
 0x85f   :  { %v884_v22 = vmul.f32 %v880_v21, %v2382_v53 }
 0x860   :  { %v890_v24 = vpop.xlane.xlu2 %889 }
 0x861   :  { %v896_v26 = vmul.f32 %v884_v22, %v884_v22  ;;  %v894_v27 = vmul.f32 %v890_v24, %v2382_v53  ;;  %v902_v45 = vsub.f32 %v876_v6, %v884_v22 }
 0x863   :  { %v898_v29 = vsub.f32 %v894_v27, %v896_v26 }
 0x865   :  { %v900_v30 = vmax.f32 %v898_v29, 0.0 }
 0x867   :  { %v904_v31 = vadd.f32 1e-05, %v900_v30  ;;  %v883_v32 = vpop.xlane.xlu1 %882 }
 0x868   :  { %v885_v33 = vmul.f32 %v883_v32, %v2382_v53 }
 0x869   :  { %2003 = vrsqrt.f32 %v904_v31  ;;  %v893_v34 = vpop.xlane.xlu0 %892  ;;  %vm912_vm13 = vweird.f32 %v904_v31 }
 0x86a   :  { %v897_v35 = vmul.f32 %v885_v33, %v885_v33  ;;  %v895_v36 = vmul.f32 %v893_v34, %v2382_v53  ;;  %v903_v56 = vsub.f32 %v877_v12, %v885_v33 }
 0x86c   :  { %v899_v63 = vsub.f32 %v895_v36, %v897_v35 }
 0x86e   :  { %v901_v37 = vmax.f32 %v899_v63, 0.0 }
 0x86f   :  { %v2004_v38 = vpop.eup %2003 }
 0x870   :  { %v907_v39 = vmul.f32 %v2004_v38, %v904_v31  ;;  %v905_v40 = vadd.f32 1e-05, %v901_v37  ;;  %vm913_vm12 = vweird.f32 %v2004_v38 }
 0x871   :  { %vm914_vm14 = vmor %vm912_vm13, %vm913_vm12 }
 0x872   :  { %v908_v0 = vmul.f32 %v2004_v38, %v907_v39  ;;  %2005 = vrsqrt.f32 %v905_v40  ;;  %vm922_vm5 = vweird.f32 %v905_v40 }
 0x874   :  { %v909_v41 = vmul.f32 0.5, %v908_v0 }
 0x876   :  { %v910_v42 = vsub.f32 1.5, %v909_v41 }
 0x878   :  { %v2006_v43 = vpop.eup %2005  ;;  %v911_v44 = vmul.f32 %v2004_v38, %v910_v42 }
 0x879   :  { %v917_v16 = vmul.f32 %v2006_v43, %v905_v40  ;;  %vm923_vm15 = vweird.f32 %v2006_v43 }
 0x87a   :  { %v915_v47 = vsel %vm914_vm14, %v2004_v38, %v911_v44  ;;  %vm924_vm6 = vmor %vm922_vm5, %vm923_vm15 }
 0x87b   :  { %v926_v48 = vmul.f32 %v915_v47, %v902_v45  ;;  %v918_v49 = vmul.f32 %v2006_v43, %v917_v16 }
 0x87d   :  { %v919_v51 = vmul.f32 0.5, %v918_v49  ;;  %v929_v52 = vmul.f32 %v928_v46, %v926_v48 }
 0x87f   :  { %v920_v18 = vsub.f32 1.5, %v919_v51  ;;  %v2453_v54 = vadd.f32 %v931_v50, %v929_v52 }
 0x881   :  { %v921_v55 = vmul.f32 %v2006_v43, %v920_v18  ;;  %1864 = vmatmul.msk.f32.vlgmr.msrb.gmra.mxu2 %vm114_vm1, %v2453_v54 }
 0x883   :  { %v925_v57 = vsel %vm924_vm6, %v2006_v43, %v921_v55 }
 0x884   :  { %v927_v58 = vmul.f32 %v925_v57, %v903_v56 }
 0x886   :  { %v930_v59 = vmul.f32 %v928_v46, %v927_v58 }
 0x888   :  { %v2457_v60 = vadd.f32 %v931_v50, %v930_v59 }
 0x88a   :  { %1865 = vmatmul.msk.f32.gmra.mxu2 %vm114_vm1, %v2457_v60 }
 0x904   :  { %v973_v25 = vpop.f32.mrf.mxu2 }
 0x905   :  { %v2467_v62 = vadd.f32 %v973_v25, %v949_v61 }
 0x907   :  { %1109 = vrot.lane.b32.xlu0 %v2467_v62, %s2133_s16  ;;  %980 = vrot.lane.b32.xlu2 %v2467_v62, %s2134_s17 }
 0x90d   :  { %v976_v1 = vpop.f32.mrf.mxu2 }
 0x90e   :  { %v2473_v2 = vadd.f32 %v976_v1, %v949_v61 }
 0x90f   :  { %1107 = vrot.lane.b32.xlu2 %v2467_v62, %s2137_s20 }
 0x910   :  { %1007 = vrot.lane.b32.xlu1 %v2473_v2, %s2134_s17  ;;  %1137 = vrot.lane.b32.xlu0 %v2473_v2, %s2133_s16  ;;  %v1945_v45 = vpack.i.bf16 %v2473_v2, %v2467_v62 }
 0x917   :  { %1135 = vrot.lane.b32.xlu2 %v2473_v2, %s2137_s20 }
 0x918   :  { %1239 = vrot.lane.b32.xlu1 %v2467_v62, %s2138_s21  ;;  %1237 = vrot.lane.b32.xlu0 %v2467_v62, %s2135_s18 }
 0x91f   :  { %1369 = vrot.lane.b32.xlu2 %v2467_v62, %s2139_s22 }
 0x920   :  { %1267 = vrot.lane.b32.xlu1 %v2473_v2, %s2138_s21  ;;  %1265 = vrot.lane.b32.xlu0 %v2473_v2, %s2135_s18 }
 0x927   :  { %1397 = vrot.lane.b32.xlu2 %v2473_v2, %s2139_s22 }
 0x928   :  { %1367 = vrot.lane.b32.xlu1 %v2467_v62, %s2140_s23  ;;  %1395 = vrot.lane.b32.xlu0 %v2473_v2, %s2140_s23  ;;  %s1803_s23 = sshll.u32 %s2684_s7, 4  ;;  %s1804_s23 = int_to_ptr.hbm [resolvable:$true] %s1803_s23 }
 0x961   :  { %v981_v3 = vpop.permute.xlu2 %980 }
 0x962   :  { %1866 = vmatpush.xpose.msk.msra.mxu3 %vm147_vm2, %v981_v3 }
 0x965   :  { %1867 = vmatmul.msk.f32.vlgmr.msra.gmra.mxu3 %vm147_vm2, %v2467_v62 }
 0x969   :  { %v1108_v4 = vpop.permute.xlu2 %1107 }
 0x971   :  { %v1136_v6 = vpop.permute.xlu2 %1135 }
 0x979   :  { %v1110_v5 = vpop.permute.xlu0 %1109  ;;  %v1370_v9 = vpop.permute.xlu2 %1369 }
 0x981   :  { %v1398_v13 = vpop.permute.xlu2 %1397 }
 0x982   :  { %v1008_v7 = vpop.permute.xlu1 %1007  ;;  %v1138_v8 = vpop.permute.xlu0 %1137 }
 0x983   :  { %1868 = vmatpush.xpose.msk.msrb.mxu0 %vm147_vm2, %v1008_v7  ;;  %1874 = vmatpush.xpose.msk.msrb.mxu1 %vm147_vm2, %v1138_v8 }
 0x986   :  { %1869 = vmatmul.msk.f32.vlgmr.msrb.gmra.mxu0 %vm147_vm2, %v2473_v2  ;;  %1875 = vmatmul.msk.f32.vlgmr.msrb.gmra.mxu1 %vm147_vm2, %v1136_v6 }
 0x987   :  { %1872 = vmatpush.xpose.msk.msra.mxu0 %vm147_vm2, %v1110_v5 }
 0x98a   :  { %v1240_v10 = vpop.permute.xlu1 %1239  ;;  %v1238_v11 = vpop.permute.xlu0 %1237 }
 0x98b   :  { %1878 = vmatpush.xpose.msk.msrb.mxu0 %vm147_vm2, %v1240_v10 }
 0x98e   :  { %1873 = vmatmul.msk.f32.vlgmr.msra.gmra.mxu0 %vm147_vm2, %v1108_v4 }
 0x98f   :  { %1884 = vmatpush.xpose.msk.msra.mxu0 %vm147_vm2, %v1370_v9 }
 0x992   :  { %v1268_v12 = vpop.permute.xlu1 %1267  ;;  %v1266_v14 = vpop.permute.xlu0 %1265 }
 0x993   :  { %1880 = vmatpush.xpose.msk.msra.mxu1 %vm147_vm2, %v1268_v12 }
 0x996   :  { %1879 = vmatmul.msk.f32.vlgmr.msrb.gmra.mxu0 %vm147_vm2, %v1238_v11  ;;  %1881 = vmatmul.msk.f32.vlgmr.msra.gmra.mxu1 %vm147_vm2, %v1266_v14 }
 0x997   :  { %1886 = vmatpush.xpose.msk.msrb.mxu1 %vm147_vm2, %v1398_v13 }
 0x99a   :  { %v1368_v15 = vpop.permute.xlu1 %1367  ;;  %v1396_v17 = vpop.permute.xlu0 %1395 }
 0x99e   :  { %1885 = vmatmul.msk.f32.vlgmr.msra.gmra.mxu0 %vm147_vm2, %v1368_v15  ;;  %1887 = vmatmul.msk.f32.vlgmr.msrb.gmra.mxu1 %vm147_vm2, %v1396_v17 }
 0x9e8   :  { %v1003_v19 = vpop.f32.mrf.mxu3 }
 0x9e9   :  { %v1033_v21 = vsel %vm147_vm2, %v1003_v19, -inf }
 0x9ea   :  { %1034 = vmax.xlane.f32.xlu1 %v1033_v21 }
 0xa03   :  { %v1030_v22 = vpop.f32.mrf.mxu0  ;;  %v1160_v23 = vpop.f32.mrf.mxu1 }
 0xa04   :  { %v1036_v24 = vsel %vm147_vm2, %v1030_v22, -inf  ;;  %v1166_v26 = vsel %vm147_vm2, %v1160_v23, -inf }
 0xa05   :  { %1037 = vmax.xlane.f32.xlu2 %v1036_v24  ;;  %1167 = vmax.xlane.f32.xlu1 %v1166_v26 }
 0xa0b   :  { %v1132_v27 = vpop.f32.mrf.mxu0 }
 0xa0c   :  { %v1163_v28 = vsel %vm147_vm2, %v1132_v27, -inf }
 0xa0d   :  { %1164 = vmax.xlane.f32.xlu0 %v1163_v28 }
 0xa13   :  { %v1262_v29 = vpop.f32.mrf.mxu0  ;;  %v1290_v30 = vpop.f32.mrf.mxu1 }
 0xa14   :  { %v1293_v31 = vsel %vm147_vm2, %v1262_v29, -inf  ;;  %v1296_v32 = vsel %vm147_vm2, %v1290_v30, -inf }
 0xa15   :  { %1294 = vmax.xlane.f32.xlu2 %v1293_v31  ;;  %1297 = vmax.xlane.f32.xlu0 %v1296_v32 }
 0xa1b   :  { %v1392_v33 = vpop.f32.mrf.mxu0  ;;  %v1420_v34 = vpop.f32.mrf.mxu1 }
 0xa1c   :  { %v1423_v35 = vsel %vm147_vm2, %v1392_v33, -inf  ;;  %v1426_v36 = vsel %vm147_vm2, %v1420_v34, -inf }
 0xa1d   :  { %1424 = vmax.xlane.f32.xlu1 %v1423_v35  ;;  %1427 = vmax.xlane.f32.xlu2 %v1426_v36 }
 0xa5d   :  { %v1035_v63 = vpop.xlane.xlu1 %1034 }
 0xa5e   :  { %v1039_v37 = vsub.f32 %v1003_v19, %v1035_v63 }
 0xa60   :  { %v1041_v38 = vmul.f32 1.442695, %v1039_v37 }
 0xa62   :  { %2007 = vpow2.f32 %v1041_v38 }
 0xa68   :  { %v2525_v39 = vpop.eup %2007 }
 0xa69   :  { %v1045_v40 = vsel %vm147_vm2, %v2525_v39, 0.0 }
 0xa6a   :  { %1046 = vadd.xlane.f32.xlu0 %v1045_v40 }
 0xa78   :  { %v1038_v0 = vpop.xlane.xlu2 %1037  ;;  %v1168_v41 = vpop.xlane.xlu1 %1167 }
 0xa79   :  { %v1040_v42 = vsub.f32 %v1030_v22, %v1038_v0  ;;  %v1170_v44 = vsub.f32 %v1160_v23, %v1168_v41 }
 0xa7b   :  { %v1043_v43 = vmul.f32 1.442695, %v1040_v42  ;;  %v1173_v16 = vmul.f32 1.442695, %v1170_v44 }
 0xa7d   :  { %2009 = vpow2.f32 %v1043_v43 }
 0xa7e   :  { %1946 = vrot.lane.b32.xlu0 %v1945_v45, %s2136_s19  ;;  %2011 = vpow2.f32 %v1173_v16 }
 0xa80   :  { %v1165_v46 = vpop.xlane.xlu0 %1164 }
 0xa81   :  { %v1169_v47 = vsub.f32 %v1132_v27, %v1165_v46 }
 0xa83   :  { %v1171_v48 = vmul.f32 1.442695, %v1169_v47  ;;  %v2010_v49 = vpop.eup %2009 }
 0xa84   :  { %v1048_v50 = vsel %vm147_vm2, %v2010_v49, 0.0  ;;  %v2533_v55 = vpop.eup %2011 }
 0xa85   :  { %2013 = vpow2.f32 %v1171_v48  ;;  %1049 = vadd.xlane.f32.xlu1 %v1048_v50  ;;  %v1178_v61 = vsel %vm147_vm2, %v2533_v55, 0.0 }
 0xa88   :  { %v1298_v51 = vpop.xlane.xlu0 %1297  ;;  %v1295_v52 = vpop.xlane.xlu2 %1294 }
 0xa89   :  { %v1300_v18 = vsub.f32 %v1290_v30, %v1298_v51  ;;  %v1299_v58 = vsub.f32 %v1262_v29, %v1295_v52 }
 0xa8b   :  { %v2535_v56 = vpop.eup %2013  ;;  %v1303_v57 = vmul.f32 1.442695, %v1300_v18  ;;  %v1301_v25 = vmul.f32 1.442695, %v1299_v58 }
 0xa8c   :  { %v1175_v59 = vsel %vm147_vm2, %v2535_v56, 0.0 }
 0xa8d   :  { %2015 = vpow2.f32 %v1303_v57  ;;  %1176 = vadd.xlane.f32.xlu2 %v1175_v59  ;;  %1179 = vadd.xlane.f32.xlu1 %v1178_v61  ;;  %v1861_v59 = vld [vmem:[%s2680_s3 + $0xb0] sm:$0xff]  ;;  %v1858_v61 = vld [vmem:[%s2680_s3 + $0x98] sm:$0xff] }
 0xa8e   :  { %2017 = vpow2.f32 %v1301_v25  ;;  %1546 = vmatpush.msrb.mxu0 %v1861_v59  ;;  %v1855_v25 = vld [vmem:[%s2680_s3 + $0x80] sm:$0xff] }
 0xa90   :  { %v1425_v3 = vpop.xlane.xlu1 %1424  ;;  %v1428_v11 = vpop.xlane.xlu2 %1427  ;;  %1547 = vmatpush.msrb.mxu0 %v1858_v61 }
 0xa91   :  { %v1429_v5 = vsub.f32 %v1392_v33, %v1425_v3  ;;  %v1430_v12 = vsub.f32 %v1420_v34, %v1428_v11 }
 0xa92   :  { %1548 = vmatpush.msrb.mxu0 %v1855_v25 }
 0xa93   :  { %v2541_v1 = vpop.eup %2015  ;;  %v1431_v7 = vmul.f32 1.442695, %v1429_v5  ;;  %v1433_v13 = vmul.f32 1.442695, %v1430_v12 }
 0xa94   :  { %v1308_v4 = vsel %vm147_vm2, %v2541_v1, 0.0  ;;  %v2545_v6 = vpop.eup %2017 }
 0xa95   :  { %1309 = vadd.xlane.f32.xlu2 %v1308_v4  ;;  %v1305_v8 = vsel %vm147_vm2, %v2545_v6, 0.0  ;;  %2019 = vpow2.f32 %v1431_v7 }
 0xa96   :  { %2021 = vpow2.f32 %v1433_v13 }
 0xa9b   :  { %v2549_v9 = vpop.eup %2019 }
 0xa9c   :  { %v1435_v10 = vsel %vm147_vm2, %v2549_v9, 0.0  ;;  %v2022_v14 = vpop.eup %2021 }
 0xa9d   :  { %1306 = vadd.xlane.f32.xlu2 %v1305_v8  ;;  %v1438_v15 = vsel %vm147_vm2, %v2022_v14, 0.0 }
 0xaa6   :  { %1951 = vrot.lane.b32.xlu1 %v1945_v45, %s2141_s24 }
 0xaa8   :  { %1436 = vadd.xlane.f32.xlu0 %v1435_v10 }
 0xab5   :  { %1956 = vrot.lane.b32.xlu2 %v1945_v45, %s2142_s25 }
 0xabd   :  { %1445 = vrot.lane.b32.xlu2 %v2467_v62, %s2143_s26 }
 0xac5   :  { %1471 = vrot.lane.b32.xlu2 %v2473_v2, %s2143_s26 }
 0xad0   :  { %1439 = vadd.xlane.f32.xlu1 %v1438_v15  ;;  %v1527_v15 = vperm.slane %v2464_v20, 1 }
 0xadd   :  { %v1047_v17 = vpop.xlane.xlu0 %1046 }
 0xade   :  { %2023 = vrcp.f32 %v1047_v17 }
 0xae4   :  { %v2024_v19 = vpop.eup %2023 }
 0xae5   :  { %v1053_v24 = vmul.f32 %v2024_v19, %v2525_v39 }
 0xaf0   :  { %v1947_v21 = vpop.permute.xlu0 %1946 }
 0xaf1   :  { %v1949_v22 = vunpack.i.h.bf16 %v1947_v21  ;;  %v1948_v23 = vunpack.i.l.bf16 %v1947_v21 }
 0xaf3   :  { %1076 = vmatpush.msra.mxu2 %v1948_v23  ;;  %1102 = vmatpush.msrb.mxu3 %v1949_v22 }
 0xaf4   :  { %1870 = vmatmul.msk.f32.vlgmr.msra.gmra.mxu2 %vm147_vm2, %v1053_v24 }
 0xaf8   :  { %v1050_v62 = vpop.xlane.xlu1 %1049 }
 0xaf9   :  { %2025 = vrcp.f32 %v1050_v62 }
 0xaff   :  { %v2026_v2 = vpop.eup %2025 }
 0xb00   :  { %v1177_v26 = vpop.xlane.xlu2 %1176  ;;  %v1054_v27 = vmul.f32 %v2026_v2, %v2010_v49  ;;  %v1180_v29 = vpop.xlane.xlu1 %1179 }
 0xb01   :  { %2027 = vrcp.f32 %v1177_v26 }
 0xb02   :  { %1871 = vmatmul.msk.f32.vlgmr.msrb.gmra.mxu3 %vm147_vm2, %v1054_v27  ;;  %2029 = vrcp.f32 %v1180_v29 }
 0xb07   :  { %v2028_v31 = vpop.eup %2027 }
 0xb08   :  { %v1310_v28 = vpop.xlane.xlu2 %1309  ;;  %v2030_v32 = vpop.eup %2029  ;;  %v1183_v39 = vmul.f32 %v2028_v31, %v2535_v56 }
 0xb09   :  { %2031 = vrcp.f32 %v1310_v28  ;;  %v1184_v38 = vmul.f32 %v2030_v32, %v2533_v55  ;;  %v1853_v32 = vld [vmem:[%s2680_s3 + $0x70] sm:$0xff] }
 0xb0f   :  { %v2032_v40 = vpop.eup %2031 }
 0xb10   :  { %v1307_v30 = vpop.xlane.xlu2 %1306  ;;  %v1314_v43 = vmul.f32 %v2032_v40, %v2541_v1  ;;  %v1852_v1 = vld [vmem:[%s2680_s3 + $0x68] sm:$0xff] }
 0xb11   :  { %2033 = vrcp.f32 %v1307_v30  ;;  %1549 = vmatpush.msrb.mxu0 %v1852_v1  ;;  %v1859_v30 = vld [vmem:[%s2680_s3 + $0xa0] sm:$0xff] }
 0xb17   :  { %v2034_v0 = vpop.eup %2033 }
 0xb18   :  { %v1957_v33 = vpop.permute.xlu2 %1956  ;;  %v1952_v34 = vpop.permute.xlu1 %1951  ;;  %v1313_v44 = vmul.f32 %v2034_v0, %v2545_v6 }
 0xb19   :  { %v1954_v35 = vunpack.i.h.bf16 %v1952_v34  ;;  %v1953_v36 = vunpack.i.l.bf16 %v1952_v34  ;;  %v1959_v63 = vunpack.i.h.bf16 %v1957_v33  ;;  %v1958_v37 = vunpack.i.l.bf16 %v1957_v33 }
 0xb1b   :  { %1206 = vmatpush.msrb.mxu2 %v1953_v36  ;;  %1232 = vmatpush.msra.mxu3 %v1954_v35  ;;  %v1437_v41 = vpop.xlane.xlu0 %1436 }
 0xb1c   :  { %1876 = vmatmul.msk.f32.vlgmr.msrb.gmra.mxu2 %vm147_vm2, %v1183_v39  ;;  %1877 = vmatmul.msk.f32.vlgmr.msra.gmra.mxu3 %vm147_vm2, %v1184_v38  ;;  %2035 = vrcp.f32 %v1437_v41 }
 0xb1d   :  { %1336 = vmatpush.msra.mxu2 %v1958_v37  ;;  %1362 = vmatpush.msrb.mxu3 %v1959_v63 }
 0xb20   :  { %v1446_v42 = vpop.permute.xlu2 %1445 }
 0xb21   :  { %1466 = vmatpush.msrb.mxu2 %v1446_v42 }
 0xb22   :  { %v2036_v45 = vpop.eup %2035 }
 0xb23   :  { %v1443_v46 = vmul.f32 %v2036_v45, %v2549_v9  ;;  %v1609_v45 = vperm.slane %v2464_v20, 2 }
 0xb24   :  { %1882 = vmatmul.msk.f32.vlgmr.msra.gmra.mxu2 %vm147_vm2, %v1313_v44  ;;  %1883 = vmatmul.msk.f32.vlgmr.msrb.gmra.mxu3 %vm147_vm2, %v1314_v43 }
 0xb28   :  { %v1472_v16 = vpop.permute.xlu2 %1471 }
 0xb29   :  { %1492 = vmatpush.msra.mxu3 %v1472_v16 }
 0xb2c   :  { %1888 = vmatmul.msk.f32.vlgmr.msrb.gmra.mxu2 %vm147_vm2, %v1443_v46 }
 0xb43   :  { %v1440_v47 = vpop.xlane.xlu1 %1439 }
 0xb44   :  { %2037 = vrcp.f32 %v1440_v47  ;;  %v1612_v47 = vperm.slane %v2464_v20, 3 }
 0xb4a   :  { %v2038_v48 = vpop.eup %2037 }
 0xb4b   :  { %v1444_v49 = vmul.f32 %v2038_v48, %v2022_v14 }
 0xb4d   :  { %1889 = vmatmul.msk.f32.vlgmr.msra.gmra.mxu3 %vm147_vm2, %v1444_v49 }
 0xb77   :  { %v1078_v50 = vpop.f32.mrf.mxu2 }
 0xb85   :  { %v1104_v51 = vpop.f32.mrf.mxu3 }
 0xb9f   :  { %v1208_v52 = vpop.f32.mrf.mxu2  ;;  %v1234_v18 = vpop.f32.mrf.mxu3 }
 0xba0   :  { %1499 = vrot.lane.b32.xlu2 %v1208_v52, %s2132_s12 }
 0xba7   :  { %v1338_v55 = vpop.f32.mrf.mxu2  ;;  %v1364_v56 = vpop.f32.mrf.mxu3 }
 0xba8   :  { %1509 = vrot.lane.b32.xlu1 %v1364_v56, %s2144_s27  ;;  %1507 = vrot.lane.b32.xlu0 %v1338_v55, %s2144_s27 }
 0xbaf   :  { %v1468_v57 = vpop.f32.mrf.mxu2 }
 0xbb0   :  { %1515 = vrot.lane.b32.xlu2 %v1468_v57, %s2145_s28 }
 0xbb8   :  { %1501 = vrot.lane.b32.xlu2 %v1234_v18, %s2132_s12 }
 0xbd0   :  { %v1494_v58 = vpop.f32.mrf.mxu3 }
 0xbd1   :  { %1517 = vrot.lane.b32.xlu0 %v1494_v58, %s2145_s28 }
 0xbfa   :  { %v1500_v3 = vpop.permute.xlu2 %1499 }
 0xbfb   :  { %v1521_v4 = vsel %vm147_vm2, %v1078_v50, %v1500_v3 }
 0xc0a   :  { %v1516_v6 = vpop.permute.xlu2 %1515 }
 0xc12   :  { %v1502_v9 = vpop.permute.xlu2 %1501 }
 0xc13   :  { %v1522_v11 = vsel %vm147_vm2, %v1104_v51, %v1502_v9 }
 0xc1a   :  { %v1508_v5 = vpop.permute.xlu0 %1507  ;;  %v1510_v10 = vpop.permute.xlu1 %1509 }
 0xc1b   :  { %v1523_v7 = vsel %vm689_vm3, %v1521_v4, %v1508_v5  ;;  %v1524_v12 = vsel %vm689_vm3, %v1522_v11, %v1510_v10  ;;  %v1901_v10 = vld [vmem:[%s2681_s4 + $0x78] sm:$0xff]  ;;  %v1900_v11 = vld [vmem:[%s2681_s4 + $0x70] sm:$0xff] }
 0xc1c   :  { %v1525_v8 = vsel %vm692_vm4, %v1523_v7, %v1516_v6  ;;  %1687 = vmatpush.msra.mxu2 %v1901_v10 }
 0xc1d   :  { %1890 = vmatmul.msk.f32.vlgmr.msrb.gmra.mxu0 %vm114_vm1, %v1525_v8 }
 0xc1e   :  { %1688 = vmatpush.msra.mxu2 %v1900_v11  ;;  %v1754_v11 = vperm.slane %v2464_v20, 6 }
 0xc43   :  { %v1518_v13 = vpop.permute.xlu0 %1517 }
 0xc44   :  { %v1526_v14 = vsel %vm692_vm4, %v1524_v12, %v1518_v13  ;;  %v1899_v12 = vld [vmem:[%s2681_s4 + $0x68] sm:$0xff]  ;;  %v1898_v13 = vld [vmem:[%s2681_s4 + $0x60] sm:$0xff] }
 0xc45   :  { %1891 = vmatmul.msk.f32.gmra.mxu0 %vm114_vm1, %v1526_v14  ;;  %1689 = vmatpush.msra.mxu2 %v1899_v12  ;;  %v1897_v14 = vld [vmem:[%s2681_s4 + $0x58] sm:$0xff] }
 0xc47   :  { %1690 = vmatpush.msra.mxu2 %v1898_v13 }
 0xc49   :  { %1691 = vmatpush.msra.mxu2 %v1897_v14  ;;  %v1757_v14 = vperm.slane %v2464_v20, 7 }
 0xc9a   :  { %v1551_v17 = vpop.f32.mrf.mxu0 }
 0xc9b   :  { %v1552_v19 = vadd.f32 %v1551_v17, %v1527_v15  ;;  %v1895_v17 = vld [vmem:[%s2681_s4 + $0x48] sm:$0xff] }
 0xc9d   :  { %v1557_v21 = vadd.f32 %v1552_v19, %v2453_v54  ;;  %v1862_v54 = vld [vmem:[%s2680_s3 + $0xb8] sm:$0xff]  ;;  %v1894_v19 = vld [vmem:[%s2681_s4 + $0x40] sm:$0xff] }
 0xc9e   :  { %1634 = vmatpush.msra.mxu1 %v1862_v54 }
 0xc9f   :  { %v1559_v22 = vsel %vm114_vm1, %v1557_v21, 0.0  ;;  %v1567_v23 = vmul.f32 %v1557_v21, %v1557_v21 }
 0xca0   :  { %1560 = vadd.xlane.f32.xlu2 %v1559_v22  ;;  %1635 = vmatpush.msra.mxu1 %v1859_v30 }
 0xca1   :  { %v1569_v24 = vsel %vm114_vm1, %v1567_v23, 0.0 }
 0xca2   :  { %1570 = vadd.xlane.f32.xlu0 %v1569_v24 }
 0xcc2   :  { %v1554_v62 = vpop.f32.mrf.mxu0 }
 0xcc3   :  { %v1555_v2 = vadd.f32 %v1554_v62, %v1527_v15  ;;  %v1896_v15 = vld [vmem:[%s2681_s4 + $0x50] sm:$0xff]  ;;  %s2147_s4 = smov [#allocation7]  }
 0xcc4   :  { %1692 = vmatpush.msra.mxu2 %v1896_v15  ;;  %s1801_s20 = sshll.u32 %s2147_s4, 4  ;;  %s1802_s20 = int_to_ptr.vmem [resolvable:$true] %s1801_s20 }
 0xcc5   :  { %v1558_v26 = vadd.f32 %v1555_v2, %v2457_v60  ;;  %v1856_v60 = vld [vmem:[%s2680_s3 + $0x88] sm:$0xff] }
 0xcc6   :  { %1636 = vmatpush.msra.mxu1 %v1856_v60  ;;  %1693 = vmatpush.msra.mxu2 %v1895_v17 }
 0xcc7   :  { %v1562_v27 = vsel %vm114_vm1, %v1558_v26, 0.0  ;;  %v1568_v28 = vmul.f32 %v1558_v26, %v1558_v26 }
 0xcc8   :  { %1563 = vadd.xlane.f32.xlu1 %v1562_v27  ;;  %1637 = vmatpush.msra.mxu1 %v1853_v32 }
 0xcc9   :  { %v1572_v29 = vsel %vm114_vm1, %v1568_v28, 0.0  ;;  %1694 = vmatpush.msra.mxu2 %v1894_v19 }
 0xcca   :  { %1573 = vadd.xlane.f32.xlu2 %v1572_v29 }
 0xd13   :  { %v1561_v31 = vpop.xlane.xlu2 %1560 }
 0xd14   :  { %v1565_v33 = vmul.f32 %v1561_v31, %v2382_v53 }
 0xd15   :  { %v1571_v34 = vpop.xlane.xlu0 %1570 }
 0xd16   :  { %v1577_v35 = vmul.f32 %v1565_v33, %v1565_v33  ;;  %v1575_v36 = vmul.f32 %v1571_v34, %v2382_v53  ;;  %v1583_v44 = vsub.f32 %v1557_v21, %v1565_v33  ;;  %v1615_v21 = vperm.slane %v2464_v20, 4 }
 0xd18   :  { %v1579_v63 = vsub.f32 %v1575_v36, %v1577_v35 }
 0xd1a   :  { %v1581_v37 = vmax.f32 %v1579_v63, 0.0 }
 0xd1c   :  { %v1585_v38 = vadd.f32 1e-05, %v1581_v37 }
 0xd1e   :  { %2039 = vrsqrt.f32 %v1585_v38  ;;  %vm1593_vm3 = vweird.f32 %v1585_v38 }
 0xd24   :  { %v2040_v39 = vpop.eup %2039 }
 0xd25   :  { %v1588_v40 = vmul.f32 %v2040_v39, %v1585_v38  ;;  %vm1594_vm2 = vweird.f32 %v2040_v39 }
 0xd26   :  { %vm1595_vm4 = vmor %vm1593_vm3, %vm1594_vm2 }
 0xd27   :  { %v1589_v0 = vmul.f32 %v2040_v39, %v1588_v40  ;;  %v1672_v40 = vperm.slane %v2464_v20, 5 }
 0xd29   :  { %v1590_v41 = vmul.f32 0.5, %v1589_v0 }
 0xd2b   :  { %v1591_v42 = vsub.f32 1.5, %v1590_v41 }
 0xd2d   :  { %v1592_v43 = vmul.f32 %v2040_v39, %v1591_v42 }
 0xd2f   :  { %v1596_v16 = vsel %vm1595_vm4, %v2040_v39, %v1592_v43 }
 0xd30   :  { %v1607_v46 = vmul.f32 %v1596_v16, %v1583_v44 }
 0xd32   :  { %v1610_v48 = vmul.f32 %v1609_v45, %v1607_v46 }
 0xd34   :  { %v2623_v49 = vadd.f32 %v1612_v47, %v1610_v48 }
 0xd36   :  { %1892 = vmatmul.msk.f32.vlgmr.msra.gmra.mxu1 %vm114_vm1, %v2623_v49 }
 0xd3b   :  { %v1564_v50 = vpop.xlane.xlu1 %1563 }
 0xd3c   :  { %v1566_v51 = vmul.f32 %v1564_v50, %v2382_v53 }
 0xd3d   :  { %v1574_v52 = vpop.xlane.xlu2 %1573 }
 0xd3e   :  { %v1578_v18 = vmul.f32 %v1566_v51, %v1566_v51  ;;  %v1576_v55 = vmul.f32 %v1574_v52, %v2382_v53  ;;  %v1584_v5 = vsub.f32 %v1558_v26, %v1566_v51  ;;  %v1763_v52 = vld [vmem:[#allocation5 + $0x18] sm:$0xff] }
 0xd3f   :  { %1784 = vmatpush.msrb.mxu3 %v1763_v52 }
 0xd40   :  { %v1580_v56 = vsub.f32 %v1576_v55, %v1578_v18  ;;  %v1761_v18 = vld [vmem:[#allocation5 + $0x8] sm:$0xff] }
 0xd42   :  { %v1582_v57 = vmax.f32 %v1580_v56, 0.0  ;;  %v1760_v56 = vld [vmem:[#allocation5] sm:$0xff] }
 0xd44   :  { %v1586_v58 = vadd.f32 1e-05, %v1582_v57 }
 0xd46   :  { %2041 = vrsqrt.f32 %v1586_v58  ;;  %vm1603_vm8 = vweird.f32 %v1586_v58 }
 0xd4c   :  { %v2042_v59 = vpop.eup %2041 }
 0xd4d   :  { %v1598_v61 = vmul.f32 %v2042_v59, %v1586_v58  ;;  %vm1604_vm7 = vweird.f32 %v2042_v59 }
 0xd4e   :  { %vm1605_vm9 = vmor %vm1603_vm8, %vm1604_vm7 }
 0xd4f   :  { %v1599_v25 = vmul.f32 %v2042_v59, %v1598_v61 }
 0xd51   :  { %v1600_v1 = vmul.f32 0.5, %v1599_v25 }
 0xd53   :  { %v1601_v3 = vsub.f32 1.5, %v1600_v1 }
 0xd55   :  { %v1602_v4 = vmul.f32 %v2042_v59, %v1601_v3 }
 0xd57   :  { %v1606_v6 = vsel %vm1605_vm9, %v2042_v59, %v1602_v4 }
 0xd58   :  { %v1608_v7 = vmul.f32 %v1606_v6, %v1584_v5 }
 0xd5a   :  { %v1611_v8 = vmul.f32 %v1609_v45, %v1608_v7 }
 0xd5c   :  { %v1614_v9 = vadd.f32 %v1612_v47, %v1611_v8 }
 0xd5e   :  { %1893 = vmatmul.msk.f32.gmra.mxu1 %vm114_vm1, %v1614_v9 }
 0xdb3   :  { %v1639_v22 = vpop.f32.mrf.mxu1 }
 0xdb4   :  { %v1640_v23 = vadd.f32 %v1639_v22, %v1615_v21 }
 0xdb6   :  { %v1647_v24 = vmul.f32 0.044715, %v1640_v23  ;;  %v1645_v29 = vmul.f32 0.5, %v1640_v23 }
 0xdb8   :  { %v1649_v62 = vmul.f32 %v1647_v24, %v1640_v23 }
 0xdba   :  { %v1651_v2 = vmul.f32 %v1649_v62, %v1640_v23 }
 0xdbc   :  { %v1653_v26 = vadd.f32 %v1651_v2, %v1640_v23 }
 0xdbe   :  { %v1655_v27 = vmul.f32 0.7978846, %v1653_v26 }
 0xdc0   :  { %2043 = vtanh.f32 %v1655_v27 }
 0xdc6   :  { %v2044_v28 = vpop.eup %2043 }
 0xdc7   :  { %v1659_v54 = vadd.f32 1.0, %v2044_v28 }
 0xdc9   :  { %v1661_v30 = vmul.f32 %v1659_v54, %v1645_v29 }
 0xdcb   :  { %1902 = vmatmul.msk.f32.vlgmr.msra.gmra.mxu2 %vm67_vm0, %v1661_v30 }
 0xddb   :  { %v1642_v60 = vpop.f32.mrf.mxu1 }
 0xddc   :  { %v1643_v31 = vadd.f32 %v1642_v60, %v1615_v21 }
 0xdde   :  { %v1648_v32 = vmul.f32 0.044715, %v1643_v31  ;;  %v1646_v37 = vmul.f32 0.5, %v1643_v31 }
 0xde0   :  { %v1650_v33 = vmul.f32 %v1648_v32, %v1643_v31 }
 0xde2   :  { %v1652_v34 = vmul.f32 %v1650_v33, %v1643_v31 }
 0xde4   :  { %v1654_v35 = vadd.f32 %v1652_v34, %v1643_v31 }
 0xde6   :  { %v1656_v36 = vmul.f32 0.7978846, %v1654_v35 }
 0xde8   :  { %2045 = vtanh.f32 %v1656_v36 }
 0xdee   :  { %v2046_v63 = vpop.eup %2045 }
 0xdef   :  { %v1660_v38 = vadd.f32 1.0, %v2046_v63 }
 0xdf1   :  { %v1662_v39 = vmul.f32 %v1660_v38, %v1646_v37 }
 0xdf3   :  { %1903 = vmatmul.msk.f32.gmra.mxu2 %vm67_vm0, %v1662_v39 }
 0xe4e   :  { %v1696_v0 = vpop.f32.mrf.mxu2 }
 0xe4f   :  { %v1697_v41 = vadd.f32 %v1696_v0, %v1672_v40 }
 0xe51   :  { %v1702_v42 = vadd.f32 %v1697_v41, %v2623_v49  ;;  %v1762_v49 = vld [vmem:[#allocation5 + $0x10] sm:$0xff] }
 0xe52   :  { %1785 = vmatpush.msrb.mxu3 %v1762_v49 }
 0xe53   :  { %v1704_v43 = vsel %vm114_vm1, %v1702_v42, 0.0  ;;  %v1712_v44 = vmul.f32 %v1702_v42, %v1702_v42 }
 0xe54   :  { %1705 = vadd.xlane.f32.xlu0 %v1704_v43  ;;  %1786 = vmatpush.msrb.mxu3 %v1761_v18 }
 0xe55   :  { %v1714_v45 = vsel %vm114_vm1, %v1712_v44, 0.0 }
 0xe56   :  { %1715 = vadd.xlane.f32.xlu2 %v1714_v45  ;;  %1787 = vmatpush.msrb.mxu3 %v1760_v56 }
 0xe76   :  { %v1699_v16 = vpop.f32.mrf.mxu2 }
 0xe77   :  { %v1700_v46 = vadd.f32 %v1699_v16, %v1672_v40 }
 0xe79   :  { %v1703_v47 = vadd.f32 %v1700_v46, %v1614_v9 }
 0xe7b   :  { %v1707_v48 = vsel %vm114_vm1, %v1703_v47, 0.0  ;;  %v1713_v50 = vmul.f32 %v1703_v47, %v1703_v47 }
 0xe7c   :  { %1708 = vadd.xlane.f32.xlu0 %v1707_v48 }
 0xe7d   :  { %v1717_v51 = vsel %vm114_vm1, %v1713_v50, 0.0 }
 0xe7e   :  { %1718 = vadd.xlane.f32.xlu2 %v1717_v51 }
 0xec7   :  { %v1706_v55 = vpop.xlane.xlu0 %1705 }
 0xec8   :  { %v1710_v57 = vmul.f32 %v1706_v55, %v2382_v53 }
 0xec9   :  { %v1716_v58 = vpop.xlane.xlu2 %1715 }
 0xeca   :  { %v1722_v59 = vmul.f32 %v1710_v57, %v1710_v57  ;;  %v1720_v61 = vmul.f32 %v1716_v58, %v2382_v53  ;;  %v1728_v10 = vsub.f32 %v1702_v42, %v1710_v57 }
 0xecc   :  { %v1724_v25 = vsub.f32 %v1720_v61, %v1722_v59 }
 0xece   :  { %v1726_v1 = vmax.f32 %v1724_v25, 0.0 }
 0xed0   :  { %v1730_v3 = vadd.f32 1e-05, %v1726_v1 }
 0xed2   :  { %2047 = vrsqrt.f32 %v1730_v3  ;;  %vm1738_vm10 = vweird.f32 %v1730_v3 }
 0xed8   :  { %v2048_v4 = vpop.eup %2047 }
 0xed9   :  { %v1733_v5 = vmul.f32 %v2048_v4, %v1730_v3  ;;  %vm1739_vm0 = vweird.f32 %v2048_v4 }
 0xeda   :  { %vm1740_vm11 = vmor %vm1738_vm10, %vm1739_vm0 }
 0xedb   :  { %v1734_v6 = vmul.f32 %v2048_v4, %v1733_v5 }
 0xedd   :  { %v1735_v7 = vmul.f32 0.5, %v1734_v6 }
 0xedf   :  { %v1736_v8 = vsub.f32 1.5, %v1735_v7 }
 0xee1   :  { %v1737_v9 = vmul.f32 %v2048_v4, %v1736_v8 }
 0xee3   :  { %v1741_v12 = vsel %vm1740_vm11, %v2048_v4, %v1737_v9 }
 0xee4   :  { %v1752_v13 = vmul.f32 %v1741_v12, %v1728_v10 }
 0xee6   :  { %v1755_v15 = vmul.f32 %v1754_v11, %v1752_v13 }
 0xee8   :  { %v1758_v17 = vadd.f32 %v1757_v14, %v1755_v15 }
 0xeea   :  { %1904 = vmatmul.msk.f32.vlgmr.msrb.gmra.mxu3 %vm114_vm1, %v1758_v17 }
 0xeef   :  { %v1709_v19 = vpop.xlane.xlu0 %1708 }
 0xef0   :  { %v1711_v21 = vmul.f32 %v1709_v19, %v2382_v53 }
 0xef1   :  { %v1719_v22 = vpop.xlane.xlu2 %1718 }
 0xef2   :  { %v1723_v23 = vmul.f32 %v1711_v21, %v1711_v21  ;;  %v1721_v24 = vmul.f32 %v1719_v22, %v2382_v53  ;;  %v1729_v60 = vsub.f32 %v1703_v47, %v1711_v21  ;;  %v1960_v53 = vld [vmem:[#allocation5 + $0x20] ss:$0 sm:$0xff] }
 0xef4   :  { %v1725_v62 = vsub.f32 %v1721_v24, %v1723_v23 }
 0xef6   :  { %v1727_v2 = vmax.f32 %v1725_v62, 0.0 }
 0xef8   :  { %v1731_v26 = vadd.f32 1e-05, %v1727_v2 }
 0xefa   :  { %2049 = vrsqrt.f32 %v1731_v26  ;;  %vm1748_vm13 = vweird.f32 %v1731_v26 }
 0xf00   :  { %v2050_v27 = vpop.eup %2049 }
 0xf01   :  { %v1743_v28 = vmul.f32 %v2050_v27, %v1731_v26  ;;  %vm1749_vm12 = vweird.f32 %v2050_v27 }
 0xf02   :  { %vm1750_vm14 = vmor %vm1748_vm13, %vm1749_vm12 }
 0xf03   :  { %v1744_v29 = vmul.f32 %v2050_v27, %v1743_v28 }
 0xf05   :  { %v1745_v54 = vmul.f32 0.5, %v1744_v29 }
 0xf07   :  { %v1746_v20 = vsub.f32 1.5, %v1745_v54 }
 0xf09   :  { %v1747_v30 = vmul.f32 %v2050_v27, %v1746_v20 }
 0xf0b   :  { %v1751_v31 = vsel %vm1750_vm14, %v2050_v27, %v1747_v30 }
 0xf0c   :  { %v1753_v32 = vmul.f32 %v1751_v31, %v1729_v60 }
 0xf0e   :  { %v1756_v33 = vmul.f32 %v1754_v11, %v1753_v32 }
 0xf10   :  { %v1759_v34 = vadd.f32 %v1757_v14, %v1756_v33 }
 0xf12   :  { %1905 = vmatmul.msk.f32.gmra.mxu3 %vm114_vm1, %v1759_v34 }
 0xf6d   :  { %v1789_v35 = vpop.f32.mrf.mxu3 }
 0xf6e   :  { %v1790_v36 = vadd.f32 %v1960_v53, %v1789_v35 }
 0xf70   :  { %1795 = vst [vmem:[#allocation7] sm:$0xff] %v1790_v36 }
 0xf95   :  { %v1792_v63 = vpop.f32.mrf.mxu3 }
 0xf96   :  { %v1793_v37 = vadd.f32 %v1960_v53, %v1792_v63 }
 0xf98   :  { %1796 = vst [vmem:[#allocation7 + $0x8] sm:$0xff] %v1793_v37 }
 0xf99   :  { %1809 = dma.vmem_to_hbm [thread:$0]  %s1802_s20, 256, %s1804_s23, [#allocation4], %s2131_s11, %s2131_s11, %s2132_s12  }
 0xf9a   :  { %2127 = dma.done.wait [#allocation4], 256  }
 0xf9b   :  { %2128 = vsyncadd [#allocation4], 4294967040 }
 0xf9c   :  { %1814 = vsyncpa [#allocation3], 1 }
 0xf9d   :  { %1815 = vsyncpa [#allocation6], 1 }
 0xf9e   :  { %1816 = vsyncpa [#allocation4], 1 }

</bundles_post_ra>
